<compile_context>
chip_gen: v7x
topology: tpu7x:2x2x1
jax: 0.10.0
libtpu: 0.0.40
codegen_flags: <defaults>
</compile_context>

<pallas_src>
import functools

import jax
import jax.numpy as jnp
import numpy as np
from jax.experimental import pallas as pl
from jax.experimental.pallas import tpu as pltpu

D_IN = 768    # RoBERTa pooler_output width
D_MID = 384   # MLP hidden width


# ------------------------------- kernels --------------------------------------
def _mlp_logits_kernel(x_ref, w1_ref, b1_ref, w2_ref, b2_ref, out_ref):
    """x: (TM, 768); w1: (768, 384); b1/w2: (1, 384); b2: (1, 1); out: (TM, 1)."""
    h = jnp.dot(x_ref[...], w1_ref[...], preferred_element_type=jnp.float32)
    h = jnp.tanh(h + b1_ref[...])
    # Linear(384 -> 1): VPU broadcast-mul + XLU lane reduction (no lane-1 MXU matmul).
    z = jnp.sum(h * w2_ref[...], axis=1, keepdims=True) + b2_ref[...]
    out_ref[...] = z


def _mlp_bce_loss_kernel(x_ref, y_ref, w1_ref, b1_ref, w2_ref, b2_ref, loss_ref,
                         *, inv_n):
    """Fused MLP head + BCEWithLogitsLoss, accumulated over row tiles."""
    i = pl.program_id(0)

    @pl.when(i == 0)
    def _():
        loss_ref[...] = jnp.zeros_like(loss_ref)

    h = jnp.dot(x_ref[...], w1_ref[...], preferred_element_type=jnp.float32)
    h = jnp.tanh(h + b1_ref[...])
    z = jnp.sum(h * w2_ref[...], axis=1, keepdims=True) + b2_ref[...]   # (TM, 1)
    y = y_ref[...]
    # numerically-stable BCEWithLogits: max(z,0) - z*y + log(1 + exp(-|z|))
    elem = jnp.maximum(z, 0.0) - z * y + jnp.log(1.0 + jnp.exp(-jnp.abs(z)))
    loss_ref[...] += jnp.sum(elem, keepdims=True) * inv_n


def _pg_loss_kernel(sc_ref, base_ref, logp_ref, loss_ref, score_ref, *,
                    inv_s, baseline_type, spi):
    """sc/logp: (B, spi); base: (B, 1); loss/score: (1, 1).

    Broadcast-subtract baseline on the VPU (no dense selection matrix).
    """
    sc = sc_ref[...]                                              # (B, spi)
    score_ref[...] = jnp.sum(sc, keepdims=True) * inv_s           # self._cur_score
    if baseline_type == "greedy":
        baseline = base_ref[...]                                  # (B, 1)
    else:  # 'sample' -> leave-one-out mean baseline
        baseline = (jnp.sum(sc, axis=1, keepdims=True) - sc) / (spi - 1.0)
    reward = sc - baseline                                        # (B, spi)
    loss_ref[...] = jnp.sum(-logp_ref[...] * reward, keepdims=True) * inv_s


# ------------------------------- wrappers --------------------------------------
def _row_tile(n):
    for tm in (256, 128, 64, 32, 16, 8):
        if n % tm == 0:
            return tm
    return n   # full-extent block (exempt from the /8 constraint)


def _weight_specs():
    return [
        pl.BlockSpec((D_IN, D_MID), lambda i: (0, 0)),
        pl.BlockSpec((1, D_MID), lambda i: (0, 0)),
        pl.BlockSpec((1, D_MID), lambda i: (0, 0)),
        pl.BlockSpec((1, 1), lambda i: (0, 0)),
    ]


def _prep_params(w1, b1, w2, b2):
    return (w1.astype(jnp.float32),
            b1.reshape(1, D_MID).astype(jnp.float32),
            w2.reshape(1, D_MID).astype(jnp.float32),
            b2.reshape(1, 1).astype(jnp.float32))


def roberta_disc_logits(pooler_out, w1, b1, w2, b2):
    """Eval forward (after the text encoder): pooler_out (N, 768) -> logits (N, 1)."""
    n, d = pooler_out.shape
    assert d == D_IN
    tm = _row_tile(n)
    grid = (n // tm,)
    gs = pltpu.PrefetchScalarGridSpec(
        num_scalar_prefetch=0, grid=grid,
        in_specs=[pl.BlockSpec((tm, D_IN), lambda i: (i, 0))] + _weight_specs(),
        out_specs=pl.BlockSpec((tm, 1), lambda i: (i, 0)),
    )
    cost = pl.CostEstimate(
        flops=2 * n * D_IN * D_MID + 3 * n * D_MID,
        transcendentals=n * D_MID,
        bytes_accessed=4 * (n * D_IN + D_IN * D_MID + 2 * D_MID + 1 + n))
    return pl.pallas_call(
        _mlp_logits_kernel,
        out_shape=jax.ShapeDtypeStruct((n, 1), jnp.float32),
        grid_spec=gs,
        compiler_params=pltpu.CompilerParams(dimension_semantics=("parallel",)),
        cost_estimate=cost,
    )(pooler_out.astype(jnp.float32), *_prep_params(w1, b1, w2, b2))


def roberta_disc_train_loss(pooler_out, labels, w1, b1, w2, b2):
    """Training forward: BCEWithLogitsLoss(MLP(pooler_out).squeeze(), labels)."""
    n, d = pooler_out.shape
    assert d == D_IN
    tm = _row_tile(n)
    grid = (n // tm,)
    kern = functools.partial(_mlp_bce_loss_kernel, inv_n=1.0 / n)
    gs = pltpu.PrefetchScalarGridSpec(
        num_scalar_prefetch=0, grid=grid,
        in_specs=[pl.BlockSpec((tm, D_IN), lambda i: (i, 0)),
                  pl.BlockSpec((tm, 1), lambda i: (i, 0))] + _weight_specs(),
        out_specs=pl.BlockSpec((1, 1), lambda i: (0, 0)),   # resident accumulator
    )
    cost = pl.CostEstimate(
        flops=2 * n * D_IN * D_MID + 8 * n * D_MID,
        transcendentals=n * D_MID + 2 * n,
        bytes_accessed=4 * (n * D_IN + D_IN * D_MID + 2 * D_MID + 1 + 2 * n))
    loss = pl.pallas_call(
        kern,
        out_shape=jax.ShapeDtypeStruct((1, 1), jnp.float32),
        grid_spec=gs,
        compiler_params=pltpu.CompilerParams(dimension_semantics=("arbitrary",)),
        cost_estimate=cost,
    )(pooler_out.astype(jnp.float32),
      labels.reshape(n, 1).astype(jnp.float32),
      *_prep_params(w1, b1, w2, b2))
    return loss[0, 0]


def roberta_disc_pg_loss(pooler_out_gen, sample_logprobs, w1, b1, w2, b2,
                         batch_size, seq_per_img, baseline_type="greedy"):
    """PG_loss.  pooler_out_gen: (S+B, 768) for 'greedy' (sampled rows first, then
    greedy baselines), or (S, 768) for 'sample'.  Returns (loss, cur_score)."""
    assert baseline_type in ("greedy", "sample")
    S = batch_size * seq_per_img
    n_rows = S + batch_size if baseline_type == "greedy" else S
    assert pooler_out_gen.shape == (n_rows, D_IN)

    scores = roberta_disc_logits(pooler_out_gen, w1, b1, w2, b2)       # (n_rows, 1)
    # wrapper-level reshapes are layout plumbing; the baseline subtract happens
    # in-kernel as a (B, spi) - (B, 1) broadcast (no dense selection matrix).
    sample_sc = scores[:S].reshape(batch_size, seq_per_img)
    if baseline_type == "greedy":
        baseline = scores[S:].reshape(batch_size, 1)
    else:
        baseline = jnp.zeros((batch_size, 1), jnp.float32)             # unused dummy
    logp = sample_logprobs.reshape(batch_size, seq_per_img).astype(jnp.float32)

    kern = functools.partial(_pg_loss_kernel, inv_s=1.0 / S,
                             baseline_type=baseline_type, spi=float(seq_per_img))
    gs = pltpu.PrefetchScalarGridSpec(
        num_scalar_prefetch=0, grid=(1,),
        in_specs=[
            pl.BlockSpec((batch_size, seq_per_img), lambda i: (0, 0)),
            pl.BlockSpec((batch_size, 1), lambda i: (0, 0)),
            pl.BlockSpec((batch_size, seq_per_img), lambda i: (0, 0)),
        ],
        out_specs=[pl.BlockSpec((1, 1), lambda i: (0, 0)),
                   pl.BlockSpec((1, 1), lambda i: (0, 0))],
    )
    loss, cur_score = pl.pallas_call(
        kern,
        out_shape=(jax.ShapeDtypeStruct((1, 1), jnp.float32),
                   jax.ShapeDtypeStruct((1, 1), jnp.float32)),
        grid_spec=gs,
        compiler_params=pltpu.CompilerParams(dimension_semantics=("arbitrary",)),
    )(sample_sc, baseline, logp)
    return loss[0, 0], cur_score[0, 0]


# --------------------------- numpy references ----------------------------------
def _ref_logits(x, w1, b1, w2, b2):
    h = np.tanh(x @ w1 + b1[None, :])
    return h @ w2.reshape(-1, 1) + b2.reshape(1, 1)


def _ref_bce(x, y, w1, b1, w2, b2):
    z = _ref_logits(x, w1, b1, w2, b2).reshape(-1)
    e = np.maximum(z, 0.0) - z * y + np.log1p(np.exp(-np.abs(z)))
    return float(e.mean())


def _ref_pg(x_gen, logp, w1, b1, w2, b2, B, spi, baseline_type):
    S = B * spi
    sc = _ref_logits(x_gen, w1, b1, w2, b2).reshape(-1)
    sample_sc = sc[:S].reshape(B, spi)
    cur_score = float(sample_sc.mean())
    if baseline_type == "greedy":
        baseline = sc[S:].reshape(B, 1)
    else:
        baseline = (sample_sc.sum(1, keepdims=True) - sample_sc) / (spi - 1)
    reward = sample_sc - baseline
    loss = float(np.mean(-logp.reshape(B, spi) * reward))
    return loss, cur_score


# ----------------------------------- main ---------------------------------------
if __name__ == "__main__":
    key = jax.random.PRNGKey(0)
    ks = jax.random.split(key, 8)

    # MLP((768, 384, 1)) "parameters"
    w1 = (0.03 * jax.random.normal(ks[0], (D_IN, D_MID))).astype(jnp.float32)
    b1 = (0.01 * jax.random.normal(ks[1], (D_MID,))).astype(jnp.float32)
    w2 = (0.05 * jax.random.normal(ks[2], (D_MID,))).astype(jnp.float32)
    b2 = jnp.zeros((1,), jnp.float32)

    # ---- training path: forward(tokens, mask, training=True, labels) ----
    # TODO(synk): RoBERTa text encoder + tokenizer not expressible in Pallas;
    #             pooler_output synthesized directly.
    n_train = 16
    pooler_train = 0.5 * jax.random.normal(ks[3], (n_train, D_IN), dtype=jnp.float32)
    labels = (jax.random.uniform(ks[4], (n_train,)) > 0.5).astype(jnp.float32)

    bce = jax.block_until_ready(
        roberta_disc_train_loss(pooler_train, labels, w1, b1, w2, b2))

    # ---- eval path logits + PG_loss ----
    B, SPI = 2, 7
    S = B * SPI
    n_gen = S + B      # sampled captions first, then greedy baselines
    pooler_gen = 0.5 * jax.random.normal(ks[5], (n_gen, D_IN), dtype=jnp.float32)
    sample_logprobs = -jnp.abs(jax.random.normal(ks[6], (S,), dtype=jnp.float32))

    logits = jax.block_until_ready(roberta_disc_logits(pooler_gen, w1, b1, w2, b2))
    pg_g, sc_g = roberta_disc_pg_loss(pooler_gen, sample_logprobs, w1, b1, w2, b2,
                                      B, SPI, baseline_type="greedy")
    pg_s, sc_s = roberta_disc_pg_loss(pooler_gen[:S], sample_logprobs, w1, b1, w2, b2,
                                      B, SPI, baseline_type="sample")
    pg_g, sc_g, pg_s, sc_s = jax.block_until_ready((pg_g, sc_g, pg_s, sc_s))

    # ---- checks against float64 numpy references ----
    w1_n, b1_n, w2_n, b2_n = (np.asarray(a, dtype=np.float64) for a in (w1, b1, w2, b2))
    x_tr = np.asarray(pooler_train, dtype=np.float64)
    y_tr = np.asarray(labels, dtype=np.float64)
    x_gen = np.asarray(pooler_gen, dtype=np.float64)
    lp = np.asarray(sample_logprobs, dtype=np.float64)

    ref_bce = _ref_bce(x_tr, y_tr, w1_n, b1_n, w2_n, b2_n)
    ref_logits = _ref_logits(x_gen, w1_n, b1_n, w2_n, b2_n)
    ref_pg_g, ref_sc_g = _ref_pg(x_gen, lp, w1_n, b1_n, w2_n, b2_n, B, SPI, "greedy")
    ref_pg_s, ref_sc_s = _ref_pg(x_gen[:S], lp, w1_n, b1_n, w2_n, b2_n, B, SPI, "sample")

    assert np.allclose(float(bce), ref_bce, rtol=2e-2, atol=2e-2), (float(bce), ref_bce)
    assert np.allclose(np.asarray(logits), ref_logits, rtol=2e-2, atol=2e-2), (
        np.max(np.abs(np.asarray(logits) - ref_logits)))
    assert np.allclose(float(pg_g), ref_pg_g, rtol=2e-2, atol=2e-2), (float(pg_g), ref_pg_g)
    assert np.allclose(float(sc_g), ref_sc_g, rtol=2e-2, atol=2e-2), (float(sc_g), ref_sc_g)
    assert np.allclose(float(pg_s), ref_pg_s, rtol=2e-2, atol=2e-2), (float(pg_s), ref_pg_s)
    assert np.allclose(float(sc_s), ref_sc_s, rtol=2e-2, atol=2e-2), (float(sc_s), ref_sc_s)

    print("KERNEL_OK")
</pallas_src>

<mosaic_0001>
module attributes {stable_mosaic.version = 11 : i64} {
  func.func @_mlp_bce_loss_kernel(%arg0: i32, %arg1: memref<16x768xf32, #tpu.memory_space<vmem>>, %arg2: memref<16x1xf32, #tpu.memory_space<vmem>>, %arg3: memref<768x384xf32, #tpu.memory_space<vmem>>, %arg4: memref<1x384xf32, #tpu.memory_space<vmem>>, %arg5: memref<1x384xf32, #tpu.memory_space<vmem>>, %arg6: memref<1x1xf32, #tpu.memory_space<vmem>>, %arg7: memref<1x1xf32, #tpu.memory_space<vmem>>) attributes {dimension_semantics = [#tpu.dimension_semantics<arbitrary>], iteration_bounds = array<i64: 1>, scalar_prefetch = 0 : i64, scratch_operands = 0 : i64, tpu.core_type = #tpu.core_type<tc>, window_params = [{transform_indices = @transform_0, window_bounds = array<i64: 16, 768>}, {transform_indices = @transform_1, window_bounds = array<i64: 16, 1>}, {pipeline_mode = #tpu.pipeline_mode<synchronous>, transform_indices = @transform_2, window_bounds = array<i64: 768, 384>}, {pipeline_mode = #tpu.pipeline_mode<synchronous>, transform_indices = @transform_3, window_bounds = array<i64: 1, 384>}, {pipeline_mode = #tpu.pipeline_mode<synchronous>, transform_indices = @transform_4, window_bounds = array<i64: 1, 384>}, {pipeline_mode = #tpu.pipeline_mode<synchronous>, transform_indices = @transform_5, window_bounds = array<i64: 1, 1>}, {pipeline_mode = #tpu.pipeline_mode<synchronous>, transform_indices = @transform_6, window_bounds = array<i64: 1, 1>}]} {
    %c0_i32 = arith.constant 0 : i32
    %0 = arith.cmpi eq, %arg0, %c0_i32 : i32
    %1 = arith.extui %0 : i1 to i32
    %c0_i32_0 = arith.constant 0 : i32
    %2 = arith.cmpi ne, %1, %c0_i32_0 : i32
    scf.if %2 {
      %cst_22 = arith.constant 0.000000e+00 : f32
      %41 = vector.broadcast %cst_22 : f32 to vector<1x1xf32>
      %c0_23 = arith.constant 0 : index
      %c0_24 = arith.constant 0 : index
      %42 = vector.load %arg7[%c0_23, %c0_24] : memref<1x1xf32, #tpu.memory_space<vmem>>, vector<1x1xf32>
      tpu.vector_store %arg7[%c0_23, %c0_24], %41 {strides = array<i32>} : memref<1x1xf32, #tpu.memory_space<vmem>>, vector<1x1xf32>,
    } else {
    }
    %c0 = arith.constant 0 : index
    %c0_1 = arith.constant 0 : index
    %3 = vector.load %arg1[%c0, %c0_1] : memref<16x768xf32, #tpu.memory_space<vmem>>, vector<16x768xf32>
    %c0_2 = arith.constant 0 : index
    %c0_3 = arith.constant 0 : index
    %4 = vector.load %arg3[%c0_2, %c0_3] : memref<768x384xf32, #tpu.memory_space<vmem>>, vector<768x384xf32>
    %cst = arith.constant dense<0.000000e+00> : vector<16x384xf32>
    %5 = tpu.matmul %3, %4, %cst {dimension_numbers = #tpu.dot_dimension_numbers<[1], [0], [0], [1], [0, 0, 1, 1], [], []>} : vector<16x768xf32>, vector<768x384xf32>, vector<16x384xf32> -> vector<16x384xf32>
    %c0_4 = arith.constant 0 : index
    %c0_5 = arith.constant 0 : index
    %6 = vector.load %arg4[%c0_4, %c0_5] : memref<1x384xf32, #tpu.memory_space<vmem>>, vector<1x384xf32>
    %7 = vector.broadcast %6 : vector<1x384xf32> to vector<16x384xf32>
    %8 = arith.addf %5, %7 : vector<16x384xf32>
    %9 = math.tanh %8 : vector<16x384xf32>
    %c0_6 = arith.constant 0 : index
    %c0_7 = arith.constant 0 : index
    %10 = vector.load %arg5[%c0_6, %c0_7] : memref<1x384xf32, #tpu.memory_space<vmem>>, vector<1x384xf32>
    %11 = vector.broadcast %10 : vector<1x384xf32> to vector<16x384xf32>
    %12 = arith.mulf %9, %11 : vector<16x384xf32>
    %cst_8 = arith.constant dense<0.000000e+00> : vector<16xf32>
    %13 = vector.multi_reduction <add>, %12, %cst_8 [1] : vector<16x384xf32> to vector<16xf32>
    %14 = vector.shape_cast %13 : vector<16xf32> to vector<16x1xf32>
    %c0_9 = arith.constant 0 : index
    %c0_10 = arith.constant 0 : index
    %15 = vector.load %arg6[%c0_9, %c0_10] : memref<1x1xf32, #tpu.memory_space<vmem>>, vector<1x1xf32>
    %16 = vector.broadcast %15 : vector<1x1xf32> to vector<16x1xf32>
    %17 = arith.addf %14, %16 : vector<16x1xf32>
    %c0_11 = arith.constant 0 : index
    %c0_12 = arith.constant 0 : index
    %18 = vector.load %arg2[%c0_11, %c0_12] : memref<16x1xf32, #tpu.memory_space<vmem>>, vector<16x1xf32>
    %cst_13 = arith.constant 0.000000e+00 : f32
    %19 = vector.broadcast %cst_13 : f32 to vector<16x1xf32>
    %20 = arith.maximumf %17, %19 : vector<16x1xf32>
    %21 = arith.mulf %17, %18 : vector<16x1xf32>
    %22 = arith.subf %20, %21 : vector<16x1xf32>
    %23 = math.absf %17 : vector<16x1xf32>
    %cst_14 = arith.constant 0.000000e+00 : f32
    %24 = vector.broadcast %cst_14 : f32 to vector<16x1xf32>
    %25 = arith.subf %24, %23 : vector<16x1xf32>
    %26 = math.exp %25 : vector<16x1xf32>
    %cst_15 = arith.constant 1.000000e+00 : f32
    %27 = vector.broadcast %cst_15 : f32 to vector<16x1xf32>
    %28 = arith.addf %27, %26 : vector<16x1xf32>
    %29 = math.log %28 : vector<16x1xf32>
    %30 = arith.addf %22, %29 : vector<16x1xf32>
    %c0_16 = arith.constant 0 : index
    %c0_17 = arith.constant 0 : index
    %31 = vector.load %arg7[%c0_16, %c0_17] : memref<1x1xf32, #tpu.memory_space<vmem>>, vector<1x1xf32>
    %32 = vector.shape_cast %30 : vector<16x1xf32> to vector<1x16x1xf32>
    %cst_18 = arith.constant dense<0.000000e+00> : vector<1xf32>
    %33 = vector.multi_reduction <add>, %32, %cst_18 [1, 2] : vector<1x16x1xf32> to vector<1xf32>
    %34 = vector.shape_cast %33 : vector<1xf32> to vector<1x1x1xf32>
    %35 = vector.extract %34[0, 0, 0] : f32 from vector<1x1x1xf32>
    %36 = vector.broadcast %35 : f32 to vector<1x1xf32>
    %cst_19 = arith.constant 6.250000e-02 : f32
    %37 = vector.broadcast %cst_19 : f32 to vector<1x1xf32>
    %38 = arith.mulf %36, %37 : vector<1x1xf32>
    %39 = arith.addf %31, %38 : vector<1x1xf32>
    %c0_20 = arith.constant 0 : index
    %c0_21 = arith.constant 0 : index
    %40 = vector.load %arg7[%c0_20, %c0_21] : memref<1x1xf32, #tpu.memory_space<vmem>>, vector<1x1xf32>
    tpu.vector_store %arg7[%c0_20, %c0_21], %39 {strides = array<i32>} : memref<1x1xf32, #tpu.memory_space<vmem>>, vector<1x1xf32>,
    return
  }
  func.func @transform_0(%arg0: i32) -> (i32, i32) {
    %c0_i32 = arith.constant 0 : i32
    %c0_i32_0 = arith.constant 0 : i32
    return %arg0, %c0_i32 : i32, i32
  }
  func.func @transform_1(%arg0: i32) -> (i32, i32) {
    %c0_i32 = arith.constant 0 : i32
    %c0_i32_0 = arith.constant 0 : i32
    return %arg0, %c0_i32 : i32, i32
  }
  func.func @transform_2(%arg0: i32) -> (i32, i32) {
    %c0_i32 = arith.constant 0 : i32
    %c0_i32_0 = arith.constant 0 : i32
    %c0_i32_1 = arith.constant 0 : i32
    return %c0_i32, %c0_i32_0 : i32, i32
  }
  func.func @transform_3(%arg0: i32) -> (i32, i32) {
    %c0_i32 = arith.constant 0 : i32
    %c0_i32_0 = arith.constant 0 : i32
    %c0_i32_1 = arith.constant 0 : i32
    return %c0_i32, %c0_i32_0 : i32, i32
  }
  func.func @transform_4(%arg0: i32) -> (i32, i32) {
    %c0_i32 = arith.constant 0 : i32
    %c0_i32_0 = arith.constant 0 : i32
    %c0_i32_1 = arith.constant 0 : i32
    return %c0_i32, %c0_i32_0 : i32, i32
  }
  func.func @transform_5(%arg0: i32) -> (i32, i32) {
    %c0_i32 = arith.constant 0 : i32
    %c0_i32_0 = arith.constant 0 : i32
    %c0_i32_1 = arith.constant 0 : i32
    return %c0_i32, %c0_i32_0 : i32, i32
  }
  func.func @transform_6(%arg0: i32) -> (i32, i32) {
    %c0_i32 = arith.constant 0 : i32
    %c0_i32_0 = arith.constant 0 : i32
    %c0_i32_1 = arith.constant 0 : i32
    return %c0_i32, %c0_i32_0 : i32, i32
  }
}

</mosaic_0001>

<bundles_post_ra>
// kernel: tpu_custom_call.1
= control target key start
LH: loop header
LB: loop body
LE: loop exit
PB: predicated region body
PF: predicated region fallthrough
CT: control target
= control target key end

     0   :  { %s1703_s0 = inlined_call_operand.hbm [shape: f32[16,768], index: 0, kind: input, shape index: {}]   ;;  %s1704_s1 = inlined_call_operand.vmem [shape: f32[16,1], index: 1, kind: input, shape index: {}]   ;;  %s1705_s2 = inlined_call_operand.hbm [shape: f32[768,384], index: 2, kind: input, shape index: {}]   ;;  %s1706_s3 = inlined_call_operand.hbm [shape: f32[1,384], index: 3, kind: input, shape index: {}]   ;;  %s1707_s4 = inlined_call_operand.hbm [shape: f32[1,384], index: 4, kind: input, shape index: {}]   ;;  %s1708_s5 = inlined_call_operand.<no memory space> [shape: f32[1,1], index: 5, kind: input, shape index: {}]   ;;  %s1709_s6 = inlined_call_operand.hbm [shape: f32[1,1], index: 6, kind: output, shape index: {}]  }
   0x1   :  { %v11_v0 = vstv %s1708_s5 }
   0x2   :  { %12 = vst [vmem:[#allocation2] sm:$0x1] %v11_v0 }
   0x3   :  { %13 = vsyncpa [#allocation4], 0 }
   0x4   :  { %14 = vsyncpa [#allocation7], 0 }
   0x5   :  { %15 = vsyncpa [#allocation10], 0 }
   0x6   :  { %16 = vsyncpa [#allocation5], 0  ;;  %s1543_s23 = smov [#allocation6]   ;;  %s1425_s27 = scalar_lea.hbm %s1705_s2, 36864 }
   0x7   :  { %s36_s24 = sshll.u32 %s1543_s23, 4  ;;  %p1426_p0 = scmp.ne.s32.totalorder %s1705_s2, %s1425_s27  ;;  %s37_s24 = int_to_ptr.vmem [resolvable:$true] %s36_s24 }
   0x8   :  { %p1429_p1 = scmp.lt.u32.totalorder %s1425_s27, %s1705_s2 }
   0xa   :  { %p1431_p2 = pnand %p1429_p1, %p1426_p0 }
   0xc   :  { %1434 = shalt.err (!%p1431_p2)
}
   0xd   :  { %s1435_s5 = scalar_lea.vmem %s37_s24, 36864  ;;  %p1440_p4 = scmp.lt.s32.totalorder %s37_s24, %s37_s24 }
   0xe   :  { %p1436_p3 = scmp.ne.s32.totalorder %s37_s24, %s1435_s5  ;;  %p1441_p5 = scmp.lt.s32.totalorder %s1435_s5, %s1435_s5 }
  0x10   :  { %p1442_p6 = por %p1441_p5, %p1440_p4 }
  0x12   :  { %p1443_p7 = pnand %p1442_p6, %p1436_p3 }
  0x14   :  { %1446 = shalt.err (!%p1443_p7)
}
  0x15   :  { %s1544_s8 = smov 384   ;;  %s1545_s9 = smov 24  }
  0x16   :  { %42 = dma.hbm_to_vmem [thread:$0]  %s1705_s2, 36864, %s37_s24, [#allocation7], %s1544_s8, %s1544_s8, %s1545_s9  }
  0x17   :  { %s1546_s12 = smov [#allocation3]   ;;  %s1447_s16 = scalar_lea.hbm %s1703_s0, 1536 }
  0x18   :  { %s22_s13 = sshll.u32 %s1546_s12, 4  ;;  %p1448_p8 = scmp.ne.s32.totalorder %s1703_s0, %s1447_s16  ;;  %s23_s13 = int_to_ptr.vmem [resolvable:$true] %s22_s13 }
  0x19   :  { %p1451_p9 = scmp.lt.u32.totalorder %s1447_s16, %s1703_s0 }
  0x1b   :  { %p1453_p10 = pnand %p1451_p9, %p1448_p8 }
  0x1d   :  { %1456 = shalt.err (!%p1453_p10)
}
  0x1e   :  { %s1457_s21 = scalar_lea.vmem %s23_s13, 1536  ;;  %p1462_p12 = scmp.lt.s32.totalorder %s23_s13, %s23_s13 }
  0x1f   :  { %p1458_p11 = scmp.ne.s32.totalorder %s23_s13, %s1457_s21  ;;  %p1463_p13 = scmp.lt.s32.totalorder %s1457_s21, %s1457_s21 }
  0x21   :  { %p1464_p0 = por %p1463_p13, %p1462_p12 }
  0x23   :  { %p1465_p1 = pnand %p1464_p0, %p1458_p11 }
  0x25   :  { %1468 = shalt.err (!%p1465_p1)
}
  0x26   :  { %s1547_s2 = smov 768   ;;  %s1548_s22 = smov 48  }
  0x27   :  { %28 = dma.hbm_to_vmem [thread:$0]  %s1703_s0, 1536, %s23_s13, [#allocation4], %s1547_s2, %s1547_s2, %s1548_s22  }
  0x28   :  { %s1549_s25 = smov [#allocation8]   ;;  %s1550_s27 = smov [#allocation9]  }
  0x29   :  { %s49_s26 = sshll.u32 %s1549_s25, 4  ;;  %s59_s28 = sshll.u32 %s1550_s27, 4  ;;  %s50_s26 = int_to_ptr.vmem [resolvable:$true] %s49_s26  ;;  %s60_s28 = int_to_ptr.vmem [resolvable:$true] %s59_s28 }
  0x2a   :  { %s1469_s7 = scalar_lea.hbm %s1706_s3, 48 }
  0x2b   :  { %p1470_p2 = scmp.ne.s32.totalorder %s1706_s3, %s1469_s7  ;;  %p1473_p3 = scmp.lt.u32.totalorder %s1469_s7, %s1706_s3 }
  0x2d   :  { %p1475_p4 = pnand %p1473_p3, %p1470_p2 }
  0x2f   :  { %1478 = shalt.err (!%p1475_p4)
}
  0x30   :  { %s1479_s0 = scalar_lea.vmem %s50_s26, 48  ;;  %s1483_s11 = scalar_lea.vmem %s50_s26, 64 }
  0x31   :  { %p1480_p5 = scmp.ne.s32.totalorder %s50_s26, %s1479_s0  ;;  %p1484_p6 = scmp.lt.s32.totalorder %s50_s26, %s50_s26 }
  0x32   :  { %p1485_p7 = scmp.lt.s32.totalorder %s1483_s11, %s1479_s0 }
  0x34   :  { %p1486_p8 = por %p1485_p7, %p1484_p6 }
  0x36   :  { %p1487_p9 = pnand %p1486_p8, %p1480_p5 }
  0x38   :  { %1490 = shalt.err (!%p1487_p9)
}
  0x39   :  { %52 = dma.hbm_to_vmem [thread:$0]  %s1706_s3, 48, %s50_s26, [#allocation7]  }
  0x3a   :  { %s1491_s16 = scalar_lea.hbm %s1707_s4, 48 }
  0x3b   :  { %p1492_p10 = scmp.ne.s32.totalorder %s1707_s4, %s1491_s16  ;;  %p1495_p11 = scmp.lt.u32.totalorder %s1491_s16, %s1707_s4 }
  0x3d   :  { %p1497_p12 = pnand %p1495_p11, %p1492_p10 }
  0x3f   :  { %1500 = shalt.err (!%p1497_p12)
}
  0x40   :  { %s1501_s21 = scalar_lea.vmem %s60_s28, 48  ;;  %s1505_s2 = scalar_lea.vmem %s60_s28, 64 }
  0x41   :  { %p1502_p13 = scmp.ne.s32.totalorder %s60_s28, %s1501_s21  ;;  %p1506_p0 = scmp.lt.s32.totalorder %s60_s28, %s60_s28 }
  0x42   :  { %p1507_p1 = scmp.lt.s32.totalorder %s1505_s2, %s1501_s21 }
  0x44   :  { %p1508_p2 = por %p1507_p1, %p1506_p0 }
  0x46   :  { %p1509_p3 = pnand %p1508_p2, %p1502_p13 }
  0x48   :  { %1512 = shalt.err (!%p1509_p3)
}
  0x49   :  { %62 = dma.hbm_to_vmem [thread:$0]  %s1707_s4, 48, %s60_s28, [#allocation10]  }
  0x4a   :  { %1535 = dma.done.wait [#allocation4], 1536  }
  0x4b   :  { %1536 = vsyncadd [#allocation4], 4294965760 }
  0x4c   :  { %1537 = dma.done.wait [#allocation7], 36912  }
  0x4d   :  { %1538 = vsyncadd [#allocation7], 4294930384 }
  0x4e   :  { %1539 = dma.done.wait [#allocation10], 48  }
  0x4f   :  { %1540 = vsyncadd [#allocation10], 4294967248  ;;  %v96_v1 = vld [vmem:[#allocation6 + $0x8] sm:$0xff]  ;;  %v99_v2 = vld [vmem:[#allocation6 + $0x20] sm:$0xff]  ;;  %vm927_vm0 = vcmask 7168   ;;  %vm81_vm1 = vcmask 0  }
  0x50   :  { %v192_v3 = vld [vmem:[#allocation6 + $0x308] sm:$0xff]  ;;  %v1077_v4 = vpack.c.bf16 %v99_v2, %v96_v1  ;;  %v195_v5 = vld [vmem:[#allocation6 + $0x320] sm:$0xff]  ;;  %v98_v7 = vld [vmem:[#allocation6 + $0x18] sm:$0xff]  ;;  %s1552_s26 = smov [#allocation11]  }
  0x51   :  { %v95_v6 = vld [vmem:[#allocation6] sm:$0xff]  ;;  %v1141_v8 = vpack.c.bf16 %v195_v5, %v192_v3  ;;  %v194_v11 = vld [vmem:[#allocation6 + $0x318] sm:$0xff]  ;;  %v105_v14 = vld [vmem:[#allocation6 + $0x50] sm:$0xff]  ;;  %s951_s27 = sshll.u32 %s1552_s26, 4  ;;  %s952_s27 = int_to_ptr.vmem [resolvable:$true] %s951_s27 }
  0x52   :  { %v1079_v9 = vpack.c.bf16 %v98_v7, %v95_v6  ;;  %v191_v10 = vld [vmem:[#allocation6 + $0x300] sm:$0xff]  ;;  %v102_v12 = vld [vmem:[#allocation6 + $0x38] sm:$0xff]  ;;  %1078 = vmatprep.subr.bf16.mxu1 %v1077_v4  ;;  %v201_v16 = vld [vmem:[#allocation6 + $0x350] sm:$0xff]  ;;  %s1513_s28 = scalar_lea.vmem %s952_s27, 16  ;;  %s1517_s29 = scalar_lea.vmem %s952_s27, 32 }
  0x53   :  { %v1143_v13 = vpack.c.bf16 %v194_v11, %v191_v10  ;;  %v198_v15 = vld [vmem:[#allocation6 + $0x338] sm:$0xff]  ;;  %1142 = vmatprep.subr.bf16.mxu0 %v1141_v8  ;;  %v1081_v17 = vpack.c.bf16 %v105_v14, %v102_v12  ;;  %v101_v19 = vld [vmem:[#allocation6 + $0x30] sm:$0xff]  ;;  %v104_v20 = vld [vmem:[#allocation6 + $0x48] sm:$0xff]  ;;  %p1514_p4 = scmp.ne.s32.totalorder %s952_s27, %s1513_s28  ;;  %p1518_p5 = scmp.lt.s32.totalorder %s952_s27, %s952_s27 }
  0x54   :  { %1080 = vmatpush1.bf16.msra.mxu1 %v1079_v9  ;;  %v1145_v18 = vpack.c.bf16 %v201_v16, %v198_v15  ;;  %v197_v21 = vld [vmem:[#allocation6 + $0x330] sm:$0xff]  ;;  %v1083_v22 = vpack.c.bf16 %v104_v20, %v101_v19  ;;  %v200_v23 = vld [vmem:[#allocation6 + $0x348] sm:$0xff]  ;;  %v111_v25 = vld [vmem:[#allocation6 + $0x80] sm:$0xff]  ;;  %p1519_p6 = scmp.lt.s32.totalorder %s1517_s29, %s1513_s28 }
  0x55   :  { %1144 = vmatpush1.bf16.msra.mxu0 %v1143_v13  ;;  %v108_v24 = vld [vmem:[#allocation6 + $0x68] sm:$0xff]  ;;  %1082 = vmatprep.subr.bf16.mxu1 %v1081_v17  ;;  %v1147_v26 = vpack.c.bf16 %v200_v23, %v197_v21  ;;  %v207_v29 = vld [vmem:[#allocation6 + $0x380] sm:$0xff]  ;;  %v110_v32 = vld [vmem:[#allocation6 + $0x78] sm:$0xff] }
  0x56   :  { %1146 = vmatprep.subr.bf16.mxu0 %v1145_v18  ;;  %v1085_v27 = vpack.c.bf16 %v111_v25, %v108_v24  ;;  %v204_v28 = vld [vmem:[#allocation6 + $0x368] sm:$0xff]  ;;  %v107_v30 = vld [vmem:[#allocation6 + $0x60] sm:$0xff]  ;;  %v206_v34 = vld [vmem:[#allocation6 + $0x378] sm:$0xff]  ;;  %p1520_p7 = por %p1519_p6, %p1518_p5 }
  0x57   :  { %v1149_v31 = vpack.c.bf16 %v207_v29, %v204_v28  ;;  %v203_v33 = vld [vmem:[#allocation6 + $0x360] sm:$0xff]  ;;  %v1087_v35 = vpack.c.bf16 %v110_v32, %v107_v30  ;;  %v114_v36 = vld [vmem:[#allocation6 + $0x98] sm:$0xff]  ;;  %v117_v37 = vld [vmem:[#allocation6 + $0xb0] sm:$0xff] }
  0x58   :  { %1084 = vmatpush1.bf16.msra.mxu1 %v1083_v22  ;;  %v210_v38 = vld [vmem:[#allocation6 + $0x398] sm:$0xff]  ;;  %v1151_v39 = vpack.c.bf16 %v206_v34, %v203_v33  ;;  %v1089_v40 = vpack.c.bf16 %v117_v37, %v114_v36  ;;  %v213_v41 = vld [vmem:[#allocation6 + $0x3b0] sm:$0xff]  ;;  %v116_v43 = vld [vmem:[#allocation6 + $0xa8] sm:$0xff]  ;;  %p1521_p8 = pnand %p1520_p7, %p1514_p4 }
  0x59   :  { %1148 = vmatpush1.bf16.msra.mxu0 %v1147_v26  ;;  %1086 = vmatprep.subr.bf16.mxu1 %v1085_v27  ;;  %v113_v42 = vld [vmem:[#allocation6 + $0x90] sm:$0xff]  ;;  %v1153_v44 = vpack.c.bf16 %v213_v41, %v210_v38  ;;  %v212_v46 = vld [vmem:[#allocation6 + $0x3a8] sm:$0xff]  ;;  %v123_v48 = vld [vmem:[#allocation6 + $0xe0] sm:$0xff] }
  0x5a   :  { %1150 = vmatprep.subr.bf16.mxu0 %v1149_v31  ;;  %v209_v45 = vld [vmem:[#allocation6 + $0x390] sm:$0xff]  ;;  %v120_v47 = vld [vmem:[#allocation6 + $0xc8] sm:$0xff]  ;;  %v219_v50 = vld [vmem:[#allocation6 + $0x3e0] sm:$0xff]  ;;  %v1091_v51 = vpack.c.bf16 %v116_v43, %v113_v42 }
  0x5b   :  { %v216_v49 = vld [vmem:[#allocation6 + $0x3c8] sm:$0xff]  ;;  %v1155_v52 = vpack.c.bf16 %v212_v46, %v209_v45  ;;  %v1093_v53 = vpack.c.bf16 %v123_v48, %v120_v47  ;;  %v119_v54 = vld [vmem:[#allocation6 + $0xc0] sm:$0xff]  ;;  %v122_v55 = vld [vmem:[#allocation6 + $0xd8] sm:$0xff] }
  0x5c   :  { %1088 = vmatpush1.bf16.msra.mxu1 %v1087_v35  ;;  %v215_v56 = vld [vmem:[#allocation6 + $0x3c0] sm:$0xff]  ;;  %v1157_v57 = vpack.c.bf16 %v219_v50, %v216_v49  ;;  %v218_v58 = vld [vmem:[#allocation6 + $0x3d8] sm:$0xff]  ;;  %v129_v60 = vld [vmem:[#allocation6 + $0x110] sm:$0xff]  ;;  %v1095_v63 = vpack.c.bf16 %v122_v55, %v119_v54 }
  0x5d   :  { %1152 = vmatpush1.bf16.msra.mxu0 %v1151_v39  ;;  %1090 = vmatprep.subr.bf16.mxu1 %v1089_v40  ;;  %v126_v59 = vld [vmem:[#allocation6 + $0xf8] sm:$0xff]  ;;  %v225_v62 = vld [vmem:[#allocation6 + $0x410] sm:$0xff]  ;;  %v1159_v0 = vpack.c.bf16 %v218_v58, %v215_v56  ;;  %v128_v3 = vld [vmem:[#allocation6 + $0x108] sm:$0xff] }
  0x5e   :  { %1154 = vmatprep.subr.bf16.mxu0 %v1153_v44  ;;  %v222_v61 = vld [vmem:[#allocation6 + $0x3f8] sm:$0xff]  ;;  %v1097_v1 = vpack.c.bf16 %v129_v60, %v126_v59  ;;  %v125_v2 = vld [vmem:[#allocation6 + $0xf0] sm:$0xff]  ;;  %v224_v6 = vld [vmem:[#allocation6 + $0x408] sm:$0xff] }
  0x5f   :  { %v221_v4 = vld [vmem:[#allocation6 + $0x3f0] sm:$0xff]  ;;  %v1161_v5 = vpack.c.bf16 %v225_v62, %v222_v61  ;;  %v132_v7 = vld [vmem:[#allocation6 + $0x128] sm:$0xff]  ;;  %v135_v8 = vld [vmem:[#allocation6 + $0x140] sm:$0xff]  ;;  %v1099_v11 = vpack.c.bf16 %v128_v3, %v125_v2 }
  0x60   :  { %1092 = vmatpush1.bf16.msra.mxu1 %v1091_v51  ;;  %v228_v9 = vld [vmem:[#allocation6 + $0x428] sm:$0xff]  ;;  %v231_v10 = vld [vmem:[#allocation6 + $0x440] sm:$0xff]  ;;  %v1163_v12 = vpack.c.bf16 %v224_v6, %v221_v4  ;;  %v1101_v13 = vpack.c.bf16 %v135_v8, %v132_v7  ;;  %v134_v15 = vld [vmem:[#allocation6 + $0x138] sm:$0xff] }
  0x61   :  { %1156 = vmatpush1.bf16.msra.mxu0 %v1155_v52  ;;  %1094 = vmatprep.subr.bf16.mxu1 %v1093_v53  ;;  %v131_v14 = vld [vmem:[#allocation6 + $0x120] sm:$0xff]  ;;  %v1165_v17 = vpack.c.bf16 %v231_v10, %v228_v9  ;;  %v230_v18 = vld [vmem:[#allocation6 + $0x438] sm:$0xff]  ;;  %v141_v20 = vld [vmem:[#allocation6 + $0x170] sm:$0xff] }
  0x62   :  { %1158 = vmatprep.subr.bf16.mxu0 %v1157_v57  ;;  %v227_v16 = vld [vmem:[#allocation6 + $0x420] sm:$0xff]  ;;  %v138_v19 = vld [vmem:[#allocation6 + $0x158] sm:$0xff]  ;;  %v237_v22 = vld [vmem:[#allocation6 + $0x470] sm:$0xff]  ;;  %v1103_v23 = vpack.c.bf16 %v134_v15, %v131_v14 }
  0x63   :  { %v234_v21 = vld [vmem:[#allocation6 + $0x458] sm:$0xff]  ;;  %v1167_v24 = vpack.c.bf16 %v230_v18, %v227_v16  ;;  %v1105_v25 = vpack.c.bf16 %v141_v20, %v138_v19  ;;  %v137_v26 = vld [vmem:[#allocation6 + $0x150] sm:$0xff]  ;;  %v140_v27 = vld [vmem:[#allocation6 + $0x168] sm:$0xff] }
  0x64   :  { %1096 = vmatpush1.bf16.msra.mxu1 %v1095_v63  ;;  %v233_v28 = vld [vmem:[#allocation6 + $0x450] sm:$0xff]  ;;  %v1169_v29 = vpack.c.bf16 %v237_v22, %v234_v21  ;;  %v236_v30 = vld [vmem:[#allocation6 + $0x468] sm:$0xff]  ;;  %v147_v32 = vld [vmem:[#allocation6 + $0x1a0] sm:$0xff]  ;;  %v1107_v35 = vpack.c.bf16 %v140_v27, %v137_v26 }
  0x65   :  { %1160 = vmatpush1.bf16.msra.mxu0 %v1159_v0  ;;  %1098 = vmatprep.subr.bf16.mxu1 %v1097_v1  ;;  %v144_v31 = vld [vmem:[#allocation6 + $0x188] sm:$0xff]  ;;  %v243_v34 = vld [vmem:[#allocation6 + $0x4a0] sm:$0xff]  ;;  %v1171_v36 = vpack.c.bf16 %v236_v30, %v233_v28  ;;  %v146_v39 = vld [vmem:[#allocation6 + $0x198] sm:$0xff] }
  0x66   :  { %1162 = vmatprep.subr.bf16.mxu0 %v1161_v5  ;;  %v240_v33 = vld [vmem:[#allocation6 + $0x488] sm:$0xff]  ;;  %v1109_v37 = vpack.c.bf16 %v147_v32, %v144_v31  ;;  %v143_v38 = vld [vmem:[#allocation6 + $0x180] sm:$0xff]  ;;  %v242_v42 = vld [vmem:[#allocation6 + $0x498] sm:$0xff] }
  0x67   :  { %v239_v40 = vld [vmem:[#allocation6 + $0x480] sm:$0xff]  ;;  %v1173_v41 = vpack.c.bf16 %v243_v34, %v240_v33  ;;  %v150_v43 = vld [vmem:[#allocation6 + $0x1b8] sm:$0xff]  ;;  %v153_v44 = vld [vmem:[#allocation6 + $0x1d0] sm:$0xff]  ;;  %v1111_v47 = vpack.c.bf16 %v146_v39, %v143_v38 }
  0x68   :  { %1100 = vmatpush1.bf16.msra.mxu1 %v1099_v11  ;;  %v246_v45 = vld [vmem:[#allocation6 + $0x4b8] sm:$0xff]  ;;  %v249_v46 = vld [vmem:[#allocation6 + $0x4d0] sm:$0xff]  ;;  %v1175_v48 = vpack.c.bf16 %v242_v42, %v239_v40  ;;  %v1113_v49 = vpack.c.bf16 %v153_v44, %v150_v43  ;;  %v152_v51 = vld [vmem:[#allocation6 + $0x1c8] sm:$0xff] }
  0x69   :  { %1164 = vmatpush1.bf16.msra.mxu0 %v1163_v12  ;;  %1102 = vmatprep.subr.bf16.mxu1 %v1101_v13  ;;  %v149_v50 = vld [vmem:[#allocation6 + $0x1b0] sm:$0xff]  ;;  %v1177_v53 = vpack.c.bf16 %v249_v46, %v246_v45  ;;  %v248_v54 = vld [vmem:[#allocation6 + $0x4c8] sm:$0xff]  ;;  %v159_v56 = vld [vmem:[#allocation6 + $0x200] sm:$0xff] }
  0x6a   :  { %1166 = vmatprep.subr.bf16.mxu0 %v1165_v17  ;;  %v245_v52 = vld [vmem:[#allocation6 + $0x4b0] sm:$0xff]  ;;  %v156_v55 = vld [vmem:[#allocation6 + $0x1e8] sm:$0xff]  ;;  %v255_v58 = vld [vmem:[#allocation6 + $0x500] sm:$0xff]  ;;  %v1115_v59 = vpack.c.bf16 %v152_v51, %v149_v50 }
  0x6b   :  { %v252_v57 = vld [vmem:[#allocation6 + $0x4e8] sm:$0xff]  ;;  %v1179_v60 = vpack.c.bf16 %v248_v54, %v245_v52  ;;  %v1117_v61 = vpack.c.bf16 %v159_v56, %v156_v55  ;;  %v155_v62 = vld [vmem:[#allocation6 + $0x1e0] sm:$0xff]  ;;  %v158_v63 = vld [vmem:[#allocation6 + $0x1f8] sm:$0xff] }
  0x6c   :  { %1104 = vmatpush1.bf16.msra.mxu1 %v1103_v23  ;;  %v251_v0 = vld [vmem:[#allocation6 + $0x4e0] sm:$0xff]  ;;  %v1181_v1 = vpack.c.bf16 %v255_v58, %v252_v57  ;;  %v254_v2 = vld [vmem:[#allocation6 + $0x4f8] sm:$0xff]  ;;  %v165_v4 = vld [vmem:[#allocation6 + $0x230] sm:$0xff]  ;;  %v1119_v7 = vpack.c.bf16 %v158_v63, %v155_v62 }
  0x6d   :  { %1168 = vmatpush1.bf16.msra.mxu0 %v1167_v24  ;;  %1106 = vmatprep.subr.bf16.mxu1 %v1105_v25  ;;  %v162_v3 = vld [vmem:[#allocation6 + $0x218] sm:$0xff]  ;;  %v261_v6 = vld [vmem:[#allocation6 + $0x530] sm:$0xff]  ;;  %v1183_v9 = vpack.c.bf16 %v254_v2, %v251_v0  ;;  %v164_v11 = vld [vmem:[#allocation6 + $0x228] sm:$0xff] }
  0x6e   :  { %1170 = vmatprep.subr.bf16.mxu0 %v1169_v29  ;;  %v258_v5 = vld [vmem:[#allocation6 + $0x518] sm:$0xff]  ;;  %v161_v8 = vld [vmem:[#allocation6 + $0x210] sm:$0xff]  ;;  %v1121_v10 = vpack.c.bf16 %v165_v4, %v162_v3  ;;  %v260_v13 = vld [vmem:[#allocation6 + $0x528] sm:$0xff] }
  0x6f   :  { %v257_v12 = vld [vmem:[#allocation6 + $0x510] sm:$0xff]  ;;  %v1185_v14 = vpack.c.bf16 %v261_v6, %v258_v5  ;;  %v168_v15 = vld [vmem:[#allocation6 + $0x248] sm:$0xff]  ;;  %v171_v16 = vld [vmem:[#allocation6 + $0x260] sm:$0xff]  ;;  %v1123_v21 = vpack.c.bf16 %v164_v11, %v161_v8 }
  0x70   :  { %1108 = vmatpush1.bf16.msra.mxu1 %v1107_v35  ;;  %v1639_v17 = vld [vmem:[#allocation3 + $0x8] sm:$0xff]  ;;  %v267_v19 = vld [vmem:[#allocation6 + $0x560] sm:$0xff]  ;;  %v1642_v20 = vld [vmem:[#allocation3 + $0x18] sm:$0xff]  ;;  %v1187_v22 = vpack.c.bf16 %v260_v13, %v257_v12  ;;  %v1125_v23 = vpack.c.bf16 %v171_v16, %v168_v15 }
  0x71   :  { %1172 = vmatpush1.bf16.msra.mxu0 %v1171_v36  ;;  %1110 = vmatprep.subr.bf16.mxu1 %v1109_v37  ;;  %v264_v18 = vld [vmem:[#allocation6 + $0x548] sm:$0xff]  ;;  %v167_v24 = vld [vmem:[#allocation6 + $0x240] sm:$0xff]  ;;  %v170_v25 = vld [vmem:[#allocation6 + $0x258] sm:$0xff] }
  0x72   :  { %1174 = vmatprep.subr.bf16.mxu0 %v1173_v41  ;;  %464 = vmatprep.mubr.f32.mxu1 %v1639_v17  ;;  %v263_v26 = vld [vmem:[#allocation6 + $0x540] sm:$0xff]  ;;  %v1189_v27 = vpack.c.bf16 %v267_v19, %v264_v18  ;;  %v266_v28 = vld [vmem:[#allocation6 + $0x558] sm:$0xff]  ;;  %v177_v30 = vld [vmem:[#allocation6 + $0x290] sm:$0xff]  ;;  %v1127_v33 = vpack.c.bf16 %v170_v25, %v167_v24 }
  0x73   :  { %541 = vmatprep.mubr.f32.mxu0 %v1642_v20  ;;  %v174_v29 = vld [vmem:[#allocation6 + $0x278] sm:$0xff]  ;;  %v273_v32 = vld [vmem:[#allocation6 + $0x590] sm:$0xff]  ;;  %v1191_v34 = vpack.c.bf16 %v266_v28, %v263_v26  ;;  %v176_v37 = vld [vmem:[#allocation6 + $0x288] sm:$0xff] }
  0x74   :  { %1112 = vmatpush1.bf16.msra.mxu1 %v1111_v47  ;;  %v270_v31 = vld [vmem:[#allocation6 + $0x578] sm:$0xff]  ;;  %v1129_v35 = vpack.c.bf16 %v177_v30, %v174_v29  ;;  %v173_v36 = vld [vmem:[#allocation6 + $0x270] sm:$0xff]  ;;  %v272_v40 = vld [vmem:[#allocation6 + $0x588] sm:$0xff] }
  0x75   :  { %1176 = vmatpush1.bf16.msra.mxu0 %v1175_v48  ;;  %1114 = vmatprep.subr.bf16.mxu1 %v1113_v49  ;;  %v269_v38 = vld [vmem:[#allocation6 + $0x570] sm:$0xff]  ;;  %v1193_v39 = vpack.c.bf16 %v273_v32, %v270_v31  ;;  %v180_v41 = vld [vmem:[#allocation6 + $0x2a8] sm:$0xff]  ;;  %v183_v42 = vld [vmem:[#allocation6 + $0x2c0] sm:$0xff]  ;;  %v1131_v45 = vpack.c.bf16 %v176_v37, %v173_v36 }
  0x76   :  { %1178 = vmatprep.subr.bf16.mxu0 %v1177_v53  ;;  %v276_v43 = vld [vmem:[#allocation6 + $0x5a8] sm:$0xff]  ;;  %v279_v44 = vld [vmem:[#allocation6 + $0x5c0] sm:$0xff]  ;;  %v1195_v46 = vpack.c.bf16 %v272_v40, %v269_v38  ;;  %v1133_v47 = vpack.c.bf16 %v183_v42, %v180_v41  ;;  %v182_v49 = vld [vmem:[#allocation6 + $0x2b8] sm:$0xff] }
  0x77   :  { %v179_v48 = vld [vmem:[#allocation6 + $0x2a0] sm:$0xff]  ;;  %v1197_v51 = vpack.c.bf16 %v279_v44, %v276_v43  ;;  %v278_v52 = vld [vmem:[#allocation6 + $0x5b8] sm:$0xff]  ;;  %v189_v54 = vld [vmem:[#allocation6 + $0x2f0] sm:$0xff] }
  0x78   :  { %1116 = vmatpush1.bf16.msra.mxu1 %v1115_v59  ;;  %v275_v50 = vld [vmem:[#allocation6 + $0x5a0] sm:$0xff]  ;;  %v186_v53 = vld [vmem:[#allocation6 + $0x2d8] sm:$0xff]  ;;  %v285_v56 = vld [vmem:[#allocation6 + $0x5f0] sm:$0xff]  ;;  %v1135_v57 = vpack.c.bf16 %v182_v49, %v179_v48 }
  0x79   :  { %1180 = vmatpush1.bf16.msra.mxu0 %v1179_v60  ;;  %1118 = vmatprep.subr.bf16.mxu1 %v1117_v61  ;;  %v282_v55 = vld [vmem:[#allocation6 + $0x5d8] sm:$0xff]  ;;  %v1199_v58 = vpack.c.bf16 %v278_v52, %v275_v50  ;;  %v1137_v59 = vpack.c.bf16 %v189_v54, %v186_v53  ;;  %v185_v60 = vld [vmem:[#allocation6 + $0x2d0] sm:$0xff]  ;;  %v188_v61 = vld [vmem:[#allocation6 + $0x2e8] sm:$0xff] }
  0x7a   :  { %1182 = vmatprep.subr.bf16.mxu0 %v1181_v1  ;;  %v281_v62 = vld [vmem:[#allocation6 + $0x5d0] sm:$0xff]  ;;  %v1201_v63 = vpack.c.bf16 %v285_v56, %v282_v55  ;;  %v284_v0 = vld [vmem:[#allocation6 + $0x5e8] sm:$0xff]  ;;  %v291_v4 = vld [vmem:[#allocation6 + $0x620] sm:$0xff]  ;;  %v1139_v5 = vpack.c.bf16 %v188_v61, %v185_v60 }
  0x7b   :  { %v145_v1 = vld [vmem:[#allocation6 + $0x190] sm:$0xff]  ;;  %v148_v2 = vld [vmem:[#allocation6 + $0x1a8] sm:$0xff]  ;;  %v1203_v6 = vpack.c.bf16 %v284_v0, %v281_v62  ;;  %v287_v8 = vld [vmem:[#allocation6 + $0x600] sm:$0xff] }
  0x7c   :  { %1120 = vmatpush1.bf16.msra.mxu1 %v1119_v7  ;;  %v288_v3 = vld [vmem:[#allocation6 + $0x608] sm:$0xff]  ;;  %v1269_v7 = vpack.c.bf16 %v148_v2, %v145_v1  ;;  %v290_v12 = vld [vmem:[#allocation6 + $0x618] sm:$0xff]  ;;  %v151_v13 = vld [vmem:[#allocation6 + $0x1c0] sm:$0xff] }
  0x7d   :  { %1184 = vmatpush1.bf16.msra.mxu0 %v1183_v9  ;;  %1122 = vmatprep.subr.bf16.mxu1 %v1121_v10  ;;  %v97_v9 = vld [vmem:[#allocation6 + $0x10] sm:$0xff]  ;;  %v100_v10 = vld [vmem:[#allocation6 + $0x28] sm:$0xff]  ;;  %v1205_v11 = vpack.c.bf16 %v291_v4, %v288_v3  ;;  %v294_v15 = vld [vmem:[#allocation6 + $0x638] sm:$0xff] }
  0x7e   :  { %1186 = vmatprep.subr.bf16.mxu0 %v1185_v14  ;;  %v154_v14 = vld [vmem:[#allocation6 + $0x1d8] sm:$0xff]  ;;  %v297_v16 = vld [vmem:[#allocation6 + $0x650] sm:$0xff]  ;;  %v1645_v18 = vld [vmem:[#allocation3] sm:$0xff] }
  0x7f   :  { %v1647_v19 = vld [vmem:[#allocation3 + $0x10] sm:$0xff]  ;;  %v103_v25 = vld [vmem:[#allocation6 + $0x40] sm:$0xff]  ;;  %v106_v26 = vld [vmem:[#allocation6 + $0x58] sm:$0xff] }
  0x80   :  { %1124 = vmatpush1.bf16.msra.mxu1 %v1123_v21  ;;  %v1271_v21 = vpack.c.bf16 %v100_v10, %v97_v9  ;;  %v293_v24 = vld [vmem:[#allocation6 + $0x630] sm:$0xff]  ;;  %v296_v28 = vld [vmem:[#allocation6 + $0x648] sm:$0xff]  ;;  %v303_v32 = vld [vmem:[#allocation6 + $0x680] sm:$0xff] }
  0x81   :  { %1188 = vmatpush1.bf16.msra.mxu0 %v1187_v22  ;;  %1126 = vmatprep.subr.bf16.mxu1 %v1125_v23  ;;  %v1207_v22 = vpack.c.bf16 %v290_v12, %v287_v8  ;;  %v1273_v23 = vpack.c.bf16 %v154_v14, %v151_v13  ;;  %v157_v29 = vld [vmem:[#allocation6 + $0x1f0] sm:$0xff]  ;;  %v160_v30 = vld [vmem:[#allocation6 + $0x208] sm:$0xff]  ;;  %v1211_v36 = vpack.c.bf16 %v296_v28, %v293_v24  ;;  %v299_v38 = vld [vmem:[#allocation6 + $0x660] sm:$0xff] }
  0x82   :  { %1190 = vmatprep.subr.bf16.mxu0 %v1189_v27  ;;  %v1209_v27 = vpack.c.bf16 %v297_v16, %v294_v15  ;;  %v300_v31 = vld [vmem:[#allocation6 + $0x668] sm:$0xff]  ;;  %v1277_v37 = vpack.c.bf16 %v160_v30, %v157_v29  ;;  %v302_v42 = vld [vmem:[#allocation6 + $0x678] sm:$0xff]  ;;  %v163_v43 = vld [vmem:[#allocation6 + $0x220] sm:$0xff] }
  0x83   :  { %v112_v40 = vld [vmem:[#allocation6 + $0x88] sm:$0xff]  ;;  %v1213_v41 = vpack.c.bf16 %v303_v32, %v300_v31  ;;  %v166_v44 = vld [vmem:[#allocation6 + $0x238] sm:$0xff]  ;;  %v1215_v48 = vpack.c.bf16 %v302_v42, %v299_v38  ;;  %v305_v50 = vld [vmem:[#allocation6 + $0x690] sm:$0xff] }
  0x84   :  { %1128 = vmatpush1.bf16.msra.mxu1 %v1127_v33  ;;  %v1650_v33 = vld [vmem:[#allocation3 + $0x38] sm:$0xff]  ;;  %v1281_v49 = vpack.c.bf16 %v166_v44, %v163_v43  ;;  %v308_v54 = vld [vmem:[#allocation6 + $0x6a8] sm:$0xff]  ;;  %v169_v55 = vld [vmem:[#allocation6 + $0x250] sm:$0xff] }
  0x85   :  { %1192 = vmatpush1.bf16.msra.mxu0 %v1191_v34  ;;  %1130 = vmatprep.subr.bf16.mxu1 %v1129_v35  ;;  %v1275_v34 = vpack.c.bf16 %v106_v26, %v103_v25  ;;  %v1653_v35 = vld [vmem:[#allocation3 + $0x30] sm:$0xff]  ;;  %v118_v52 = vld [vmem:[#allocation6 + $0xb8] sm:$0xff]  ;;  %v172_v56 = vld [vmem:[#allocation6 + $0x268] sm:$0xff]  ;;  %v1219_v60 = vpack.c.bf16 %v308_v54, %v305_v50 }
  0x86   :  { %1194 = vmatprep.subr.bf16.mxu0 %v1193_v39  ;;  %v109_v39 = vld [vmem:[#allocation6 + $0x70] sm:$0xff]  ;;  %v311_v61 = vld [vmem:[#allocation6 + $0x6c0] sm:$0xff]  ;;  %v314_v1 = vld [vmem:[#allocation6 + $0x6d8] sm:$0xff] }
  0x87   :  { %v121_v62 = vld [vmem:[#allocation6 + $0xd0] sm:$0xff]  ;;  %v175_v2 = vld [vmem:[#allocation6 + $0x280] sm:$0xff]  ;;  %v178_v3 = vld [vmem:[#allocation6 + $0x298] sm:$0xff] }
  0x88   :  { %1132 = vmatpush1.bf16.msra.mxu1 %v1131_v45  ;;  %v306_v45 = vld [vmem:[#allocation6 + $0x698] sm:$0xff]  ;;  %v1289_v8 = vpack.c.bf16 %v178_v3, %v175_v2  ;;  %v317_v9 = vld [vmem:[#allocation6 + $0x6f0] sm:$0xff]  ;;  %v127_v10 = vld [vmem:[#allocation6 + $0x100] sm:$0xff] }
  0x89   :  { %1196 = vmatpush1.bf16.msra.mxu0 %v1195_v46  ;;  %1134 = vmatprep.subr.bf16.mxu1 %v1133_v47  ;;  %v309_v46 = vld [vmem:[#allocation6 + $0x6b0] sm:$0xff]  ;;  %v1279_v47 = vpack.c.bf16 %v112_v40, %v109_v39  ;;  %v318_v4 = vld [vmem:[#allocation6 + $0x6f8] sm:$0xff]  ;;  %v320_v13 = vld [vmem:[#allocation6 + $0x708] sm:$0xff] }
  0x8a   :  { %1198 = vmatprep.subr.bf16.mxu0 %v1197_v51  ;;  %v115_v51 = vld [vmem:[#allocation6 + $0xa0] sm:$0xff]  ;;  %v1217_v53 = vpack.c.bf16 %v309_v46, %v306_v45  ;;  %v181_v14 = vld [vmem:[#allocation6 + $0x2b0] sm:$0xff]  ;;  %v184_v15 = vld [vmem:[#allocation6 + $0x2c8] sm:$0xff]  ;;  %v1227_v25 = vpack.c.bf16 %v320_v13, %v317_v9 }
  0x8b   :  { %v324_v16 = vld [vmem:[#allocation6 + $0x728] sm:$0xff]  ;;  %v1293_v26 = vpack.c.bf16 %v184_v15, %v181_v14  ;;  %v1660_v29 = vld [vmem:[#allocation3 + $0x40] sm:$0xff]  ;;  %v326_v31 = vld [vmem:[#allocation6 + $0x738] sm:$0xff] }
  0x8c   :  { %1136 = vmatpush1.bf16.msra.mxu1 %v1135_v57  ;;  %v312_v57 = vld [vmem:[#allocation6 + $0x6c8] sm:$0xff]  ;;  %v187_v32 = vld [vmem:[#allocation6 + $0x2e0] sm:$0xff]  ;;  %v329_v42 = vld [vmem:[#allocation6 + $0x750] sm:$0xff] }
  0x8d   :  { %1200 = vmatpush1.bf16.msra.mxu0 %v1199_v58  ;;  %1138 = vmatprep.subr.bf16.mxu1 %v1137_v59  ;;  %v315_v58 = vld [vmem:[#allocation6 + $0x6e0] sm:$0xff]  ;;  %v1283_v59 = vpack.c.bf16 %v118_v52, %v115_v51  ;;  %v1658_v24 = vld [vmem:[#allocation3 + $0x48] sm:$0xff]  ;;  %v142_v44 = vld [vmem:[#allocation6 + $0x178] sm:$0xff] }
  0x8e   :  { %1202 = vmatprep.subr.bf16.mxu0 %v1201_v63  ;;  %v124_v63 = vld [vmem:[#allocation6 + $0xe8] sm:$0xff]  ;;  %v1221_v0 = vpack.c.bf16 %v315_v58, %v312_v57  ;;  %v139_v43 = vld [vmem:[#allocation6 + $0x160] sm:$0xff]  ;;  %v338_v58 = vld [vmem:[#allocation6 + $0x798] sm:$0xff] }
  0x8f   :  { %v136_v28 = vld [vmem:[#allocation6 + $0x148] sm:$0xff]  ;;  %v339_v50 = vld [vmem:[#allocation6 + $0x7a0] sm:$0xff]  ;;  %v1299_v51 = vpack.c.bf16 %v142_v44, %v139_v43  ;;  %v202_v3 = vld [vmem:[#allocation6 + $0x358] sm:$0xff] }
  0x90   :  { %1140 = vmatpush1.bf16.msra.mxu1 %v1139_v5  ;;  %v321_v5 = vld [vmem:[#allocation6 + $0x710] sm:$0xff]  ;;  %v1664_v39 = vld [vmem:[#allocation3 + $0x28] sm:$0xff]  ;;  %v335_v54 = vld [vmem:[#allocation6 + $0x780] sm:$0xff] }
  0x91   :  { %1204 = vmatpush1.bf16.msra.mxu0 %v1203_v6  ;;  %1270 = vmatprep.subr.bf16.mxu1 %v1269_v7  ;;  %v1287_v6 = vpack.c.bf16 %v124_v63, %v121_v62  ;;  %v1223_v7 = vpack.c.bf16 %v314_v1, %v311_v61  ;;  %v1225_v12 = vpack.c.bf16 %v321_v5, %v318_v4  ;;  %v332_v46 = vld [vmem:[#allocation6 + $0x768] sm:$0xff]  ;;  %v345_v61 = vld [vmem:[#allocation6 + $0x7d0] sm:$0xff]  ;;  %v199_v2 = vld [vmem:[#allocation6 + $0x340] sm:$0xff] }
  0x92   :  { %1206 = vmatprep.subr.bf16.mxu0 %v1205_v11  ;;  %v130_v11 = vld [vmem:[#allocation6 + $0x118] sm:$0xff]  ;;  %v1235_v52 = vpack.c.bf16 %v332_v46, %v329_v42  ;;  %v1239_v63 = vpack.c.bf16 %v338_v58, %v335_v54  ;;  %v341_v1 = vld [vmem:[#allocation6 + $0x7b0] sm:$0xff]  ;;  %v344_v5 = vld [vmem:[#allocation6 + $0x7c8] sm:$0xff] }
  0x93   :  { %465 = vmatmul.mubr.f32.vlgmr.msra.gmra.mrb[0].mxu1 %v1645_v18  ;;  %v351_v9 = vld [vmem:[#allocation6 + $0x800] sm:$0xff]  ;;  %v205_v14 = vld [vmem:[#allocation6 + $0x370] sm:$0xff]  ;;  %v208_v15 = vld [vmem:[#allocation6 + $0x388] sm:$0xff] }
  0x94   :  { %542 = vmatmul.mubr.f32.vlgmr.msra.gmra.mrb[0].mxu0 %v1647_v19  ;;  %1272 = vmatpush3.bf16.msra.mxu1 %v1271_v21  ;;  %v327_v21 = vld [vmem:[#allocation6 + $0x740] sm:$0xff]  ;;  %v217_v43 = vld [vmem:[#allocation6 + $0x3d0] sm:$0xff]  ;;  %v220_v44 = vld [vmem:[#allocation6 + $0x3e8] sm:$0xff] }
  0x95   :  { %1208 = vmatpush1.bf16.msra.mxu0 %v1207_v22  ;;  %1274 = vmatprep.subr.bf16.mxu1 %v1273_v23  ;;  %v1291_v22 = vpack.c.bf16 %v130_v11, %v127_v10  ;;  %v323_v23 = vld [vmem:[#allocation6 + $0x720] sm:$0xff]  ;;  %v1229_v30 = vpack.c.bf16 %v327_v21, %v324_v16  ;;  %v1307_v10 = vpack.c.bf16 %v202_v3, %v199_v2  ;;  %v350_v21 = vld [vmem:[#allocation6 + $0x7f8] sm:$0xff]  ;;  %v365_v54 = vld [vmem:[#allocation6 + $0x870] sm:$0xff] }
  0x96   :  { %1210 = vmatprep.subr.bf16.mxu0 %v1209_v27  ;;  %470 = vmatprep.mubr.f32.mxu1 %v1650_v33  ;;  %v133_v27 = vld [vmem:[#allocation6 + $0x130] sm:$0xff]  ;;  %v1231_v40 = vpack.c.bf16 %v326_v31, %v323_v23  ;;  %v1243_v11 = vpack.c.bf16 %v344_v5, %v341_v1  ;;  %v347_v13 = vld [vmem:[#allocation6 + $0x7e0] sm:$0xff]  ;;  %v262_v23 = vld [vmem:[#allocation6 + $0x538] sm:$0xff] }
  0x97   :  { %471 = vmatmul.mubr.f32.gmra.mrb[2].mxu1 %v1653_v35  ;;  %547 = vmatprep.mubr.f32.mxu0 %v1658_v24  ;;  %v1295_v38 = vpack.c.bf16 %v136_v28, %v133_v27  ;;  %v353_v28 = vld [vmem:[#allocation6 + $0x810] sm:$0xff]  ;;  %v214_v31 = vld [vmem:[#allocation6 + $0x3b8] sm:$0xff]  ;;  %v359_v42 = vld [vmem:[#allocation6 + $0x840] sm:$0xff] }
  0x98   :  { %1276 = vmatpush3.bf16.msra.mxu1 %v1275_v34  ;;  %695 = vmatprep.mubr.f32.mxu1 %v1639_v17  ;;  %v1285_v17 = vpack.c.bf16 %v172_v56, %v169_v55  ;;  %v190_v34 = vld [vmem:[#allocation6 + $0x2f8] sm:$0xff]  ;;  %v193_v55 = vld [vmem:[#allocation6 + $0x310] sm:$0xff]  ;;  %v196_v56 = vld [vmem:[#allocation6 + $0x328] sm:$0xff] }
  0x99   :  { %1212 = vmatpush1.bf16.msra.mxu0 %v1211_v36  ;;  %1278 = vmatprep.subr.bf16.mxu1 %v1277_v37  ;;  %v330_v36 = vld [vmem:[#allocation6 + $0x758] sm:$0xff]  ;;  %v333_v37 = vld [vmem:[#allocation6 + $0x770] sm:$0xff]  ;;  %v1303_v62 = vpack.c.bf16 %v196_v56, %v193_v55  ;;  %v223_v55 = vld [vmem:[#allocation6 + $0x400] sm:$0xff] }
  0x9a   :  { %1214 = vmatprep.subr.bf16.mxu0 %v1213_v41  ;;  %548 = vmatmul.mubr.f32.gmra.mrb[2].mxu0 %v1660_v29  ;;  %v1297_v41 = vpack.c.bf16 %v190_v34, %v187_v32  ;;  %v1233_v45 = vpack.c.bf16 %v333_v37, %v330_v36  ;;  %v356_v34 = vld [vmem:[#allocation6 + $0x828] sm:$0xff]  ;;  %v265_v36 = vld [vmem:[#allocation6 + $0x550] sm:$0xff]  ;;  %v362_v46 = vld [vmem:[#allocation6 + $0x858] sm:$0xff] }
  0x9b   :  { %618 = vmatprep.mubr.f32.mxu0 %v1664_v39  ;;  %v268_v37 = vld [vmem:[#allocation6 + $0x568] sm:$0xff]  ;;  %v226_v56 = vld [vmem:[#allocation6 + $0x418] sm:$0xff]  ;;  %v371_v1 = vld [vmem:[#allocation6 + $0x8a0] sm:$0xff] }
  0x9c   :  { %1280 = vmatpush3.bf16.msra.mxu1 %v1279_v47  ;;  %v241_v47 = vld [vmem:[#allocation6 + $0x490] sm:$0xff]  ;;  %v368_v58 = vld [vmem:[#allocation6 + $0x888] sm:$0xff]  ;;  %v374_v5 = vld [vmem:[#allocation6 + $0x8b8] sm:$0xff] }
  0x9d   :  { %1216 = vmatpush1.bf16.msra.mxu0 %v1215_v48  ;;  %1282 = vmatprep.subr.bf16.mxu1 %v1281_v49  ;;  %v244_v48 = vld [vmem:[#allocation6 + $0x4a8] sm:$0xff]  ;;  %v229_v2 = vld [vmem:[#allocation6 + $0x430] sm:$0xff] }
  0x9e   :  { %1218 = vmatprep.subr.bf16.mxu0 %v1217_v53  ;;  %v336_v49 = vld [vmem:[#allocation6 + $0x788] sm:$0xff]  ;;  %v1301_v53 = vpack.c.bf16 %v244_v48, %v241_v47  ;;  %v271_v47 = vld [vmem:[#allocation6 + $0x580] sm:$0xff]  ;;  %v274_v48 = vld [vmem:[#allocation6 + $0x598] sm:$0xff] }
  0x9f   :  { %v1237_v57 = vpack.c.bf16 %v339_v50, %v336_v49  ;;  %v366_v49 = vld [vmem:[#allocation6 + $0x878] sm:$0xff]  ;;  %v369_v50 = vld [vmem:[#allocation6 + $0x890] sm:$0xff]  ;;  %v232_v3 = vld [vmem:[#allocation6 + $0x448] sm:$0xff] }
  0xa0   :  { %1284 = vmatpush3.bf16.msra.mxu1 %v1283_v59  ;;  %v247_v59 = vld [vmem:[#allocation6 + $0x4c0] sm:$0xff] }
  0xa1   :  { %1220 = vmatpush1.bf16.msra.mxu0 %v1219_v60  ;;  %1286 = vmatprep.subr.bf16.mxu1 %v1285_v17  ;;  %v250_v60 = vld [vmem:[#allocation6 + $0x4d8] sm:$0xff] }
  0xa2   :  { %1222 = vmatprep.subr.bf16.mxu0 %v1221_v0  ;;  %v342_v17 = vld [vmem:[#allocation6 + $0x7b8] sm:$0xff]  ;;  %v1305_v0 = vpack.c.bf16 %v250_v60, %v247_v59  ;;  %v277_v59 = vld [vmem:[#allocation6 + $0x5b0] sm:$0xff]  ;;  %v280_v60 = vld [vmem:[#allocation6 + $0x5c8] sm:$0xff] }
  0xa3   :  { %v1241_v4 = vpack.c.bf16 %v345_v61, %v342_v17  ;;  %v372_v17 = vld [vmem:[#allocation6 + $0x8a8] sm:$0xff]  ;;  %v375_v61 = vld [vmem:[#allocation6 + $0x8c0] sm:$0xff] }
  0xa4   :  { %1288 = vmatpush3.bf16.msra.mxu1 %v1287_v6  ;;  %v253_v6 = vld [vmem:[#allocation6 + $0x4f0] sm:$0xff] }
  0xa5   :  { %1224 = vmatpush1.bf16.msra.mxu0 %v1223_v7  ;;  %1290 = vmatprep.subr.bf16.mxu1 %v1289_v8  ;;  %v256_v7 = vld [vmem:[#allocation6 + $0x508] sm:$0xff] }
  0xa6   :  { %1226 = vmatprep.subr.bf16.mxu0 %v1225_v12  ;;  %v348_v8 = vld [vmem:[#allocation6 + $0x7e8] sm:$0xff]  ;;  %v1309_v12 = vpack.c.bf16 %v256_v7, %v253_v6  ;;  %v283_v6 = vld [vmem:[#allocation6 + $0x5e0] sm:$0xff]  ;;  %v286_v7 = vld [vmem:[#allocation6 + $0x5f8] sm:$0xff] }
  0xa7   :  { %v1245_v16 = vpack.c.bf16 %v351_v9, %v348_v8  ;;  %v378_v8 = vld [vmem:[#allocation6 + $0x8d8] sm:$0xff]  ;;  %v381_v9 = vld [vmem:[#allocation6 + $0x8f0] sm:$0xff] }
  0xa8   :  { %1292 = vmatpush3.bf16.msra.mxu1 %v1291_v22  ;;  %v259_v22 = vld [vmem:[#allocation6 + $0x520] sm:$0xff] }
  0xa9   :  { %1228 = vmatpush1.bf16.msra.mxu0 %v1227_v25  ;;  %1294 = vmatprep.subr.bf16.mxu1 %v1293_v26  ;;  %v354_v25 = vld [vmem:[#allocation6 + $0x818] sm:$0xff]  ;;  %v1311_v26 = vpack.c.bf16 %v208_v15, %v205_v14  ;;  %v1313_v27 = vpack.c.bf16 %v262_v23, %v259_v22  ;;  %v235_v14 = vld [vmem:[#allocation6 + $0x460] sm:$0xff]  ;;  %v337_v22 = vld [vmem:[#allocation6 + $0x790] sm:$0xff] }
  0xaa   :  { %1230 = vmatprep.subr.bf16.mxu0 %v1229_v30  ;;  %v211_v30 = vld [vmem:[#allocation6 + $0x3a0] sm:$0xff]  ;;  %v238_v15 = vld [vmem:[#allocation6 + $0x478] sm:$0xff]  ;;  %v340_v23 = vld [vmem:[#allocation6 + $0x7a8] sm:$0xff] }
  0xac   :  { %1296 = vmatpush3.bf16.msra.mxu1 %v1295_v38  ;;  %v360_v38 = vld [vmem:[#allocation6 + $0x848] sm:$0xff] }
  0xad   :  { %1232 = vmatpush1.bf16.msra.mxu0 %v1231_v40  ;;  %1298 = vmatprep.subr.bf16.mxu1 %v1297_v41  ;;  %v363_v40 = vld [vmem:[#allocation6 + $0x860] sm:$0xff]  ;;  %v1251_v41 = vpack.c.bf16 %v356_v34, %v353_v28 }
  0xae   :  { %1234 = vmatprep.subr.bf16.mxu0 %v1233_v45  ;;  %v1253_v45 = vpack.c.bf16 %v363_v40, %v360_v38  ;;  %v343_v28 = vld [vmem:[#allocation6 + $0x7c0] sm:$0xff]  ;;  %v349_v40 = vld [vmem:[#allocation6 + $0x7f0] sm:$0xff] }
  0xaf   :  { %v295_v34 = vld [vmem:[#allocation6 + $0x640] sm:$0xff] }
  0xb0   :  { %1300 = vmatpush3.bf16.msra.mxu1 %v1299_v51  ;;  %v1319_v51 = vpack.c.bf16 %v220_v44, %v217_v43  ;;  %v301_v43 = vld [vmem:[#allocation6 + $0x670] sm:$0xff]  ;;  %v304_v44 = vld [vmem:[#allocation6 + $0x688] sm:$0xff] }
  0xb1   :  { %1236 = vmatpush1.bf16.msra.mxu0 %v1235_v52  ;;  %1302 = vmatprep.subr.bf16.mxu1 %v1301_v53  ;;  %v1255_v52 = vpack.c.bf16 %v362_v46, %v359_v42  ;;  %v1321_v53 = vpack.c.bf16 %v274_v48, %v271_v47  ;;  %v358_v46 = vld [vmem:[#allocation6 + $0x838] sm:$0xff]  ;;  %v307_v48 = vld [vmem:[#allocation6 + $0x6a0] sm:$0xff] }
  0xb2   :  { %1238 = vmatprep.subr.bf16.mxu0 %v1237_v57  ;;  %v1257_v57 = vpack.c.bf16 %v369_v50, %v366_v49  ;;  %v310_v49 = vld [vmem:[#allocation6 + $0x6b8] sm:$0xff]  ;;  %v361_v50 = vld [vmem:[#allocation6 + $0x850] sm:$0xff] }
  0xb3   :  { %696 = vmatmul.mubr.f32.vlgmr.msra.gmra.mrb[4].mxu1 %v1645_v18  ;;  %v357_v18 = vld [vmem:[#allocation6 + $0x830] sm:$0xff] }
  0xb4   :  { %1304 = vmatpush3.bf16.msra.mxu1 %v1303_v62  ;;  %700 = vmatprep.mubr.f32.mxu1 %v1650_v33  ;;  %v1247_v33 = vpack.c.bf16 %v350_v21, %v347_v13  ;;  %v1249_v32 = vpack.c.bf16 %v357_v18, %v354_v25  ;;  %v1323_v62 = vpack.c.bf16 %v226_v56, %v223_v55  ;;  %v377_v13 = vld [vmem:[#allocation6 + $0x8d0] sm:$0xff]  ;;  %v380_v21 = vld [vmem:[#allocation6 + $0x8e8] sm:$0xff]  ;;  %v370_v55 = vld [vmem:[#allocation6 + $0x898] sm:$0xff] }
  0xb5   :  { %1240 = vmatpush1.bf16.msra.mxu0 %v1239_v63  ;;  %1306 = vmatprep.subr.bf16.mxu1 %v1305_v0  ;;  %v1259_v63 = vpack.c.bf16 %v368_v58, %v365_v54  ;;  %v1325_v0 = vpack.c.bf16 %v280_v60, %v277_v59  ;;  %v1331_v25 = vpack.c.bf16 %v238_v15, %v235_v14  ;;  %v367_v54 = vld [vmem:[#allocation6 + $0x880] sm:$0xff]  ;;  %v322_v59 = vld [vmem:[#allocation6 + $0x718] sm:$0xff]  ;;  %v376_v60 = vld [vmem:[#allocation6 + $0x8c8] sm:$0xff] }
  0xb6   :  { %1242 = vmatprep.subr.bf16.mxu0 %v1241_v4  ;;  %v1261_v4 = vpack.c.bf16 %v375_v61, %v372_v17  ;;  %v1267_v18 = vpack.c.bf16 %v380_v21, %v377_v13  ;;  %v319_v58 = vld [vmem:[#allocation6 + $0x700] sm:$0xff]  ;;  %v385_v21 = vlaneseq }
  0xb7   :  { %701 = vmatmul.mubr.f32.gmra.mrb[6].mxu1 %v1653_v35  ;;  %v1315_v35 = vpack.c.bf16 %v214_v31, %v211_v30  ;;  %v346_v30 = vld [vmem:[#allocation6 + $0x7d8] sm:$0xff]  ;;  %v1355_v17 = vpack.c.bf16 %v322_v59, %v319_v58 }
  0xb8   :  { %1308 = vmatpush3.bf16.msra.mxu1 %v1307_v10  ;;  %770 = vmatprep.mubr.f32.mxu1 %v1642_v20  ;;  %v1317_v20 = vpack.c.bf16 %v268_v37, %v265_v36  ;;  %v1327_v10 = vpack.c.bf16 %v232_v3, %v229_v2  ;;  %v298_v36 = vld [vmem:[#allocation6 + $0x658] sm:$0xff]  ;;  %v1337_v38 = vpack.c.bf16 %v346_v30, %v343_v28 }
  0xb9   :  { %1244 = vmatpush1.bf16.msra.mxu0 %v1243_v11  ;;  %1310 = vmatprep.subr.bf16.mxu1 %v1309_v12  ;;  %v1263_v11 = vpack.c.bf16 %v374_v5, %v371_v1  ;;  %v1329_v12 = vpack.c.bf16 %v286_v7, %v283_v6  ;;  %v94_v37 = vld [vmem:[#allocation3 + $0x58] sm:$0xff] }
  0xba   :  { %1246 = vmatprep.subr.bf16.mxu0 %v1245_v16  ;;  %v1265_v16 = vpack.c.bf16 %v381_v9, %v378_v8  ;;  %v382_v1 = vld [vmem:[#allocation6 + $0x8f8] sm:$0xff] }
  0xbb   :  { %v334_v5 = vld [vmem:[#allocation6 + $0x778] sm:$0xff] }
  0xbc   :  { %1312 = vmatpush3.bf16.msra.mxu1 %v1311_v26  ;;  %v1333_v26 = vpack.c.bf16 %v340_v23, %v337_v22  ;;  %v386_v22 = vshrl.u32 %v385_v21, 7 }
  0xbd   :  { %1248 = vmatpush1.bf16.msra.mxu0 %v1247_v33  ;;  %1314 = vmatprep.subr.bf16.mxu1 %v1313_v27  ;;  %v289_v33 = vld [vmem:[#allocation6 + $0x610] sm:$0xff]  ;;  %v292_v27 = vld [vmem:[#allocation6 + $0x628] sm:$0xff] }
  0xbe   :  { %1250 = vmatprep.subr.bf16.mxu0 %v1249_v32  ;;  %v1335_v31 = vpack.c.bf16 %v292_v27, %v289_v33  ;;  %v1671_v32 = vld [vmem:[#allocation3 + $0x20] sm:$0xff]  ;;  %v387_v23 = vsub.s32 0, %v386_v22 }
  0xc0   :  { %1316 = vmatpush3.bf16.msra.mxu1 %v1315_v35  ;;  %v352_v35 = vld [vmem:[#allocation6 + $0x808] sm:$0xff] }
  0xc1   :  { %1252 = vmatpush1.bf16.msra.mxu0 %v1251_v41  ;;  %1318 = vmatprep.subr.bf16.mxu1 %v1317_v20  ;;  %v1339_v41 = vpack.c.bf16 %v298_v36, %v295_v34  ;;  %v1675_v20 = vld [vmem:[#allocation3 + $0x50] sm:$0xff]  ;;  %v1341_v42 = vpack.c.bf16 %v352_v35, %v349_v40 }
  0xc2   :  { %1254 = vmatprep.subr.bf16.mxu0 %v1253_v45  ;;  %v355_v45 = vld [vmem:[#allocation6 + $0x820] sm:$0xff] }
  0xc3   :  { %v1345_v47 = vpack.c.bf16 %v358_v46, %v355_v45 }
  0xc4   :  { %1320 = vmatpush3.bf16.msra.mxu1 %v1319_v51  ;;  %v364_v51 = vld [vmem:[#allocation6 + $0x868] sm:$0xff] }
  0xc5   :  { %1256 = vmatpush1.bf16.msra.mxu0 %v1255_v52  ;;  %1322 = vmatprep.subr.bf16.mxu1 %v1321_v53  ;;  %v313_v52 = vld [vmem:[#allocation6 + $0x6d0] sm:$0xff]  ;;  %v316_v53 = vld [vmem:[#allocation6 + $0x6e8] sm:$0xff] }
  0xc6   :  { %1258 = vmatprep.subr.bf16.mxu0 %v1257_v57  ;;  %v1351_v56 = vpack.c.bf16 %v316_v53, %v313_v52  ;;  %v1353_v57 = vpack.c.bf16 %v370_v55, %v367_v54 }
  0xc8   :  { %1324 = vmatpush3.bf16.msra.mxu1 %v1323_v62  ;;  %v325_v62 = vld [vmem:[#allocation6 + $0x730] sm:$0xff] }
  0xc9   :  { %1260 = vmatpush1.bf16.msra.mxu0 %v1259_v63  ;;  %1326 = vmatprep.subr.bf16.mxu1 %v1325_v0  ;;  %v328_v63 = vld [vmem:[#allocation6 + $0x748] sm:$0xff]  ;;  %v379_v0 = vld [vmem:[#allocation6 + $0x8e0] sm:$0xff] }
  0xca   :  { %1262 = vmatprep.subr.bf16.mxu0 %v1261_v4  ;;  %v1359_v2 = vpack.c.bf16 %v328_v63, %v325_v62  ;;  %v1361_v3 = vpack.c.bf16 %v382_v1, %v379_v0  ;;  %v331_v4 = vld [vmem:[#allocation6 + $0x760] sm:$0xff] }
  0xcb   :  { %v1363_v6 = vpack.c.bf16 %v334_v5, %v331_v4 }
  0xcc   :  { %1328 = vmatpush3.bf16.msra.mxu1 %v1327_v10 }
  0xcd   :  { %1264 = vmatpush1.bf16.msra.mxu0 %v1263_v11  ;;  %1330 = vmatprep.subr.bf16.mxu1 %v1329_v12 }
  0xce   :  { %1266 = vmatprep.subr.bf16.mxu0 %v1265_v16 }
  0xd0   :  { %1332 = vmatpush3.bf16.msra.mxu1 %v1331_v25  ;;  %v383_v25 = vld [vmem:[#allocation8] sm:$0x7] }
  0xd1   :  { %1268 = vmatpush1.bf16.msra.mxu0 %v1267_v18  ;;  %1365 = vmatprep.subr.bf16.mxu1 %v1333_v26  ;;  %v391_v18 = vsub.s32 1, %v386_v22  ;;  %v388_v33 = vrot.slane %v383_v25, %v387_v23 }
  0xd2   :  { %1334 = vmatprep.subr.bf16.mxu0 %v1333_v26  ;;  %v395_v26 = vsub.s32 2, %v386_v22 }
  0xd3   :  { %771 = vmatmul.mubr.f32.vlgmr.msra.gmra.mrb[8].mxu1 %v1647_v19  ;;  %v1343_v19 = vpack.c.bf16 %v304_v44, %v301_v43  ;;  %v392_v27 = vrot.slane %v383_v25, %v391_v18 }
  0xd4   :  { %619 = vmatmul.mubr.f32.vlgmr.msra.gmra.mrb[0].mxu0 %v1671_v32  ;;  %1373 = vmatpush3.bf16.msra.mxu1 %v1335_v31  ;;  %v396_v28 = vrot.slane %v383_v25, %v395_v26 }
  0xd5   :  { %1336 = vmatpush3.bf16.msra.mxu0 %v1335_v31  ;;  %624 = vmatprep.mubr.f32.mxu0 %v94_v37 }
  0xd6   :  { %775 = vmatprep.mubr.f32.mxu1 %v1658_v24  ;;  %1338 = vmatprep.subr.bf16.mxu0 %v1337_v38  ;;  %v1347_v24 = vpack.c.bf16 %v310_v49, %v307_v48 }
  0xd7   :  { %776 = vmatmul.mubr.f32.gmra.mrb[10].mxu1 %v1660_v29  ;;  %1366 = vmatprep.subr.bf16.mxu1 %v1337_v38  ;;  %v1349_v29 = vpack.c.bf16 %v364_v51, %v361_v50 }
  0xd8   :  { %625 = vmatmul.mubr.f32.gmra.mrb[2].mxu0 %v1675_v20  ;;  %1374 = vmatpush3.bf16.msra.mxu1 %v1339_v41 }
  0xd9   :  { %1340 = vmatpush3.bf16.msra.mxu0 %v1339_v41  ;;  %1367 = vmatprep.subr.bf16.mxu1 %v1341_v42 }
  0xda   :  { %1342 = vmatprep.subr.bf16.mxu0 %v1341_v42  ;;  %845 = vmatprep.mubr.f32.mxu0 %v1664_v39  ;;  %v373_v39 = vld [vmem:[#allocation6 + $0x8b0] sm:$0xff] }
  0xdb   :  { %850 = vmatprep.mubr.f32.mxu1 %v94_v37  ;;  %v1357_v61 = vpack.c.bf16 %v376_v60, %v373_v39 }
  0xdc   :  { %1375 = vmatpush3.bf16.msra.mxu1 %v1343_v19 }
  0xdd   :  { %1344 = vmatpush3.bf16.msra.mxu0 %v1343_v19  ;;  %1368 = vmatprep.subr.bf16.mxu1 %v1345_v47 }
  0xde   :  { %1346 = vmatprep.subr.bf16.mxu0 %v1345_v47 }
  0xe0   :  { %1376 = vmatpush3.bf16.msra.mxu1 %v1347_v24 }
  0xe1   :  { %1348 = vmatpush3.bf16.msra.mxu0 %v1347_v24  ;;  %1369 = vmatprep.subr.bf16.mxu1 %v1349_v29  ;;  %v862_v24 = vld [vmem:[#allocation9] sm:$0x7] }
  0xe2   :  { %1350 = vmatprep.subr.bf16.mxu0 %v1349_v29  ;;  %v867_v29 = vrot.slane %v862_v24, %v387_v23  ;;  %v871_v52 = vrot.slane %v862_v24, %v391_v18  ;;  %v875_v5 = vrot.slane %v862_v24, %v395_v26 }
  0xe4   :  { %1377 = vmatpush3.bf16.msra.mxu1 %v1351_v56 }
  0xe5   :  { %1352 = vmatpush3.bf16.msra.mxu0 %v1351_v56  ;;  %1370 = vmatprep.subr.bf16.mxu1 %v1353_v57 }
  0xe6   :  { %1354 = vmatprep.subr.bf16.mxu0 %v1353_v57 }
  0xe8   :  { %1378 = vmatpush3.bf16.msra.mxu1 %v1355_v17 }
  0xe9   :  { %1356 = vmatpush3.bf16.msra.mxu0 %v1355_v17  ;;  %1371 = vmatprep.subr.bf16.mxu1 %v1357_v61 }
  0xea   :  { %1358 = vmatprep.subr.bf16.mxu0 %v1357_v61 }
  0xec   :  { %1379 = vmatpush3.bf16.msra.mxu1 %v1359_v2 }
  0xed   :  { %1360 = vmatpush3.bf16.msra.mxu0 %v1359_v2  ;;  %1372 = vmatprep.subr.bf16.mxu1 %v1361_v3 }
  0xee   :  { %1362 = vmatprep.subr.bf16.mxu0 %v1361_v3 }
  0xf0   :  { %1380 = vmatpush3.bf16.msra.mxu1 %v1363_v6 }
  0xf1   :  { %1364 = vmatpush3.bf16.msra.mxu0 %v1363_v6 }
  0xf3   :  { %851 = vmatmul.mubr.f32.vlgmr.msra.gmra.mrb[12].mxu1 %v1675_v20 }
  0xf4   :  { %846 = vmatmul.mubr.f32.vlgmr.msra.gmra.mrb[4].mxu0 %v1671_v32 }
 0x166   :  { %v466_v7 = vpop.f32.mrb[0].mxu1 }
 0x167   :  { %v468_v8 = vpop.f32.mrb[1].mxu1  ;;  %v467_v30 = vadd.f32 %v466_v7, %v388_v33 }
 0x168   :  { %v469_v32 = vadd.f32 %v468_v8, %v392_v27 }
 0x16a   :  { %v472_v9 = vpop.f32.mrb[2].mxu1 }
 0x16b   :  { %v474_v10 = vpop.f32.mrb[3].mxu1  ;;  %v473_v20 = vadd.f32 %v472_v9, %v388_v33 }
 0x16c   :  { %v475_v44 = vadd.f32 %v474_v10, %v392_v27 }
 0x186   :  { %v995_v11 = vpop.f32.mrb[4].mxu1 }
 0x187   :  { %v996_v12 = vpop.f32.mrb[5].mxu1 }
 0x188   :  { %v997_v13 = vadd.f32 %v996_v12, %v995_v11  ;;  %v962_v12 = vld [vmem:[#allocation2] ss:$0 sm:$0xff] }
 0x18a   :  { %v998_v14 = vpop.f32.mrb[6].mxu1  ;;  %v698_v37 = vadd.f32 %v997_v13, %v396_v28 }
 0x18b   :  { %v999_v15 = vpop.f32.mrb[7].mxu1 }
 0x18c   :  { %v1000_v16 = vadd.f32 %v999_v15, %v998_v14 }
 0x18e   :  { %v703_v19 = vadd.f32 %v1000_v16, %v396_v28 }
 0x1a6   :  { %v1033_v31 = vpop.f32.mrb[8].mxu1 }
 0x1a7   :  { %v620_v34 = vpop.f32.mrb[0].mxu0  ;;  %v1034_v36 = vpop.f32.mrb[9].mxu1 }
 0x1a8   :  { %v1382_v38 = vadd.f32 %v620_v34, %v467_v30  ;;  %v622_v40 = vpop.f32.mrb[1].mxu0  ;;  %v1035_v35 = vadd.f32 %v1034_v36, %v1033_v31  ;;  %v902_v31 = vld [vmem:[%s1704_s1] sm:$0xff] }
 0x1a9   :  { %v1384_v41 = vadd.f32 %v622_v40, %v469_v32  ;;  %v903_v32 = vld [vmem:[%s1704_s1 + $0x8] sm:$0xff] }
 0x1aa   :  { %1405 = vtanh.f32 %v1382_v38  ;;  %v773_v42 = vadd.f32 %v1035_v35, %v698_v37  ;;  %v1036_v43 = vpop.f32.mrb[10].mxu1 }
 0x1ab   :  { %1407 = vtanh.f32 %v1384_v41  ;;  %v626_v45 = vpop.f32.mrb[2].mxu0  ;;  %v1037_v46 = vpop.f32.mrb[11].mxu1 }
 0x1ac   :  { %v1386_v47 = vadd.f32 %v626_v45, %v473_v20  ;;  %v628_v48 = vpop.f32.mrb[3].mxu0  ;;  %v1038_v49 = vadd.f32 %v1037_v46, %v1036_v43 }
 0x1ad   :  { %v1388_v50 = vadd.f32 %v628_v48, %v475_v44  ;;  %v1551_v48 = vmov 0.0  }
 0x1ae   :  { %1409 = vtanh.f32 %v1386_v47  ;;  %v778_v51 = vadd.f32 %v1038_v49, %v703_v19  ;;  %82 = vst.msk [vmem:[#allocation11] sm:$0x1] %vm81_vm1, %v1551_v48 }
 0x1af   :  { %1411 = vtanh.f32 %v1388_v50 }
 0x1b4   :  { %v1406_v53 = vpop.eup %1405 }
 0x1b5   :  { %v1408_v54 = vpop.eup %1407  ;;  %v879_v55 = vmul.f32 %v1406_v53, %v867_v29 }
 0x1b6   :  { %v880_v56 = vmul.f32 %v1408_v54, %v871_v52  ;;  %v926_v54 = vld [vmem:[#allocation11] sm:$0x1] }
 0x1b8   :  { %v1410_v57 = vpop.eup %1409  ;;  %v885_v58 = vadd.f32 %v880_v56, %v879_v55 }
 0x1b9   :  { %v1412_v59 = vpop.eup %1411  ;;  %v882_v39 = vmul.f32 %v1410_v57, %v867_v29 }
 0x1ba   :  { %v883_v60 = vmul.f32 %v1412_v59, %v871_v52 }
 0x1bc   :  { %v889_v17 = vadd.f32 %v883_v60, %v882_v39 }
 0x1c6   :  { %v1074_v61 = vpop.f32.mrb[12].mxu1 }
 0x1c7   :  { %v1071_v62 = vpop.f32.mrb[4].mxu0  ;;  %v1075_v63 = vpop.f32.mrb[13].mxu1 }
 0x1c8   :  { %v1072_v0 = vpop.f32.mrb[5].mxu0  ;;  %v1076_v1 = vadd.f32 %v1075_v63, %v1074_v61 }
 0x1c9   :  { %v1073_v2 = vadd.f32 %v1072_v0, %v1071_v62 }
 0x1ca   :  { %v853_v3 = vadd.f32 %v1076_v1, %v778_v51 }
 0x1cb   :  { %v848_v4 = vadd.f32 %v1073_v2, %v773_v42 }
 0x1cc   :  { %1413 = vtanh.f32 %v853_v3 }
 0x1cd   :  { %1415 = vtanh.f32 %v848_v4 }
 0x1d6   :  { %v1414_v6 = vpop.eup %1413 }
 0x1d7   :  { %v1416_v7 = vpop.eup %1415  ;;  %v884_v8 = vmul.f32 %v1414_v6, %v875_v5 }
 0x1d8   :  { %v881_v9 = vmul.f32 %v1416_v7, %v875_v5 }
 0x1d9   :  { %v890_v10 = vadd.f32 %v889_v17, %v884_v8 }
 0x1da   :  { %v886_v11 = vadd.f32 %v885_v58, %v881_v9 }
 0x1dc   :  { %887 = vadd.xlane.f32.xlu0 %v886_v11 }
 0x1e0   :  { %891 = vadd.xlane.f32.xlu0 %v890_v10 }
 0x269   :  { %v888_v13 = vpop.xlane.xlu0 %887 }
 0x26a   :  { %v900_v14 = vadd.f32 %v962_v12, %v888_v13 }
 0x26c   :  { %v910_v15 = vand.u32 2147483647, %v900_v14  ;;  %v904_v34 = vmax.f32 %v900_v14, 0.0  ;;  %v906_v36 = vmul.f32 %v902_v31, %v900_v14 }
 0x26d   :  { %v892_v16 = vpop.xlane.xlu0 %891 }
 0x26e   :  { %v912_v21 = vsub.f32 0.0, %v910_v15  ;;  %v901_v22 = vadd.f32 %v962_v12, %v892_v16  ;;  %v908_v41 = vsub.f32 %v904_v34, %v906_v36 }
 0x270   :  { %v914_v23 = vmul.f32 1.442695, %v912_v21  ;;  %v911_v25 = vand.u32 2147483647, %v901_v22  ;;  %v905_v38 = vmax.f32 %v901_v22, 0.0  ;;  %v907_v40 = vmul.f32 %v903_v32, %v901_v22 }
 0x272   :  { %1417 = vpow2.f32 %v914_v23  ;;  %v913_v18 = vsub.f32 0.0, %v911_v25  ;;  %v909_v42 = vsub.f32 %v905_v38, %v907_v40 }
 0x274   :  { %v916_v26 = vmul.f32 1.442695, %v913_v18 }
 0x276   :  { %1419 = vpow2.f32 %v916_v26 }
 0x27c   :  { %v1418_v33 = vpop.eup %1417 }
 0x27d   :  { %v918_v27 = vadd.f32 1.0, %v1418_v33 }
 0x27f   :  { %1421 = vlog2.f32 %v918_v27 }
 0x280   :  { %v1420_v28 = vpop.eup %1419 }
 0x281   :  { %v919_v30 = vadd.f32 1.0, %v1420_v28 }
 0x283   :  { %1423 = vlog2.f32 %v919_v30 }
 0x289   :  { %v1422_v37 = vpop.eup %1421 }
 0x28a   :  { %v921_v35 = vmul.f32 0.6931472, %v1422_v37 }
 0x28c   :  { %v924_v44 = vadd.f32 %v921_v35, %v908_v41 }
 0x28d   :  { %v1424_v20 = vpop.eup %1423 }
 0x28e   :  { %v923_v43 = vmul.f32 0.6931472, %v1424_v20  ;;  %v928_v46 = vsel %vm927_vm0, %v924_v44, 0.0 }
 0x290   :  { %v925_v45 = vadd.f32 %v923_v43, %v909_v42 }
 0x292   :  { %v929_v19 = vsel %vm927_vm0, %v925_v45, 0.0 }
 0x293   :  { %v930_v47 = vadd.f32 %v929_v19, %v928_v46 }
 0x295   :  { %931 = vadd.xlane.f32.xlu1 %v930_v47 }
 0x322   :  { %v932_v49 = vpop.xlane.xlu1 %931 }
 0x323   :  { %v933_v50 = vrot.slane %v932_v49, 4 }
 0x325   :  { %v934_v51 = vadd.f32 %v933_v50, %v932_v49 }
 0x327   :  { %v935_v24 = vrot.slane %v934_v51, 2 }
 0x329   :  { %v936_v29 = vadd.f32 %v935_v24, %v934_v51 }
 0x32b   :  { %v937_v52 = vrot.slane %v936_v29, 1 }
 0x32d   :  { %v938_v53 = vadd.f32 %v937_v52, %v936_v29 }
 0x32f   :  { %1393 = vpush %v938_v53 }
 0x360   :  { %s1394_s1 = spop %1393 }
 0x361   :  { %v940_v55 = vstv %s1394_s1 }
 0x362   :  { %v941_v56 = vmul.f32 0.0625, %v940_v55 }
 0x364   :  { %v942_v57 = vadd.f32 %v941_v56, %v926_v54 }
 0x366   :  { %944 = vst.msk [vmem:[#allocation11] sm:$0x1] %vm81_vm1, %v942_v57 }
 0x367   :  { %1524 = shalt.err (!%p1521_p8)
}
 0x368   :  { %s1525_s5 = scalar_lea.hbm %s1709_s6, 16 }
 0x369   :  { %p1526_p9 = scmp.ne.s32.totalorder %s1709_s6, %s1525_s5  ;;  %p1529_p10 = scmp.lt.u32.totalorder %s1525_s5, %s1709_s6 }
 0x36b   :  { %p1531_p11 = pnand %p1529_p10, %p1526_p9 }
 0x36d   :  { %1534 = shalt.err (!%p1531_p11)
}
 0x36e   :  { %954 = dma.vmem_to_hbm [thread:$0]  %s952_s27, 16, %s1709_s6, [#allocation5]  }
 0x36f   :  { %1541 = dma.done.wait [#allocation5], 16  }
 0x370   :  { %1542 = vsyncadd [#allocation5], 4294967280 }
 0x371   :  { %958 = vsyncpa [#allocation4], 1 }
 0x372   :  { %959 = vsyncpa [#allocation7], 1 }
 0x373   :  { %960 = vsyncpa [#allocation10], 1 }
 0x374   :  { %961 = vsyncpa [#allocation5], 1 }

</bundles_post_ra>
